<compile_context>
chip_gen: v6e
topology: v6e:2x2x1
jax: 0.10.0
libtpu: 0.0.40
codegen_flags: <defaults>
</compile_context>

<pallas_src>
import functools

import jax
import jax.numpy as jnp
from jax.experimental import pallas as pl
from jax.experimental.pallas import tpu as pltpu


LATENT_DIMS = 8
HIDDEN_DIMS = 64
CLASS_NUM = 4
BN_EPS = 1e-5
LEAKY_SLOPE = 0.01  # PyTorch nn.LeakyReLU default


def _leaky_relu(x):
    # max + mul (2 VPU ops) instead of cmp + mul + select (3).
    return jnp.maximum(x, LEAKY_SLOPE * x)


def _discnet_kernel(
    x_ref,            # (L, tile_n)  bf16   lane-dense input block
    w1_ref, b1_ref,   # (H, L) bf16, (H, 1) act_dtype
    w2_ref, b2_ref,   # (H, H) bf16 (BN1 folded), (H, 1) act_dtype
    w3_ref, b3_ref,   # (C, H) bf16 (BN2 folded), (C, 1) f32
    out_ref,          # (C, tile_n) f32   lane-dense output block
    *, act_dtype,
):
    # ---- Linear 1 + LeakyReLU (MXU f32 accumulation, act_dtype epilogue) ----
    h = jnp.dot(w1_ref[...], x_ref[...], preferred_element_type=jnp.float32)
    h = _leaky_relu(h.astype(act_dtype) + b1_ref[...])

    # ---- Linear 2 (BN1 folded into W2/b2) + LeakyReLU ----
    h = jnp.dot(w2_ref[...], h.astype(jnp.bfloat16),
                preferred_element_type=jnp.float32)
    h = _leaky_relu(h.astype(act_dtype) + b2_ref[...])

    # ---- Dropout: identity in eval mode ----

    # ---- Linear 3 (BN2 folded into W3/b3), logits kept in f32 ----
    logits = jnp.dot(w3_ref[...], h.astype(jnp.bfloat16),
                     preferred_element_type=jnp.float32)
    logits = logits + b3_ref[...]

    # ---- softmax over the class dim (sublane axis, only C rows) ----
    m = jnp.max(logits, axis=0, keepdims=True)         # (1, tile_n)
    e = jnp.exp(logits - m)                             # (C, tile_n)
    denom = jnp.sum(e, axis=0, keepdims=True)           # (1, tile_n)
    # Exact divide: rows must sum to 1 for downstream consumers; the block is
    # tiny so the cost is negligible (approx reciprocal was not normalized
    # tightly enough).
    out_ref[...] = (e / denom).astype(out_ref.dtype)


def _pick_tile_n(n, max_tile):
    """Multiple of 128 lanes; aim for >=2 grid steps (v7x megacore) while
    capping the tile so it amortizes the ~0.35us/step grid overhead."""
    half = (n + 1) // 2
    half = ((half + 127) // 128) * 128
    return max(128, min(max_tile, half))


def discnet_forward(x, params, *, tile_n=None, max_tile_n=8192,
                    epilogue_dtype=jnp.bfloat16, out_layout="nc"):
    """x: (N, LATENT_DIMS) float. Returns (N, CLASS_NUM) f32 probabilities
    (or (CLASS_NUM, N) if out_layout == "cn", avoiding the output transpose).

    On v5e pass epilogue_dtype=jnp.float32 (no bf16 VPU)."""
    n, latent = x.shape
    assert latent == LATENT_DIMS

    if tile_n is None:
        tile_n = _pick_tile_n(n, max_tile_n)
    assert tile_n % 128 == 0
    n_pad = pl.cdiv(n, tile_n) * tile_n

    # Lane-dense bf16 input layout: (L, n_pad).  Transpose + cast + pad happen
    # wrapper-side; ideally the producer would emit this layout directly.
    xt = x.astype(jnp.bfloat16).T
    if n_pad != n:
        xt = jnp.pad(xt, ((0, 0), (0, n_pad - n)))

    # Fold BatchNorm (eval) into per-feature scale/shift ...
    def fold_bn(gamma, beta, mean, var):
        scale = gamma / jnp.sqrt(var + BN_EPS)
        shift = beta - mean * scale
        return scale, shift

    s1, t1 = fold_bn(params["bn1_gamma"], params["bn1_beta"],
                     params["bn1_mean"], params["bn1_var"])
    s2, t2 = fold_bn(params["bn2_gamma"], params["bn2_beta"],
                     params["bn2_mean"], params["bn2_var"])

    # ... and then fold the scale/shift into the *next* Linear (exact, since
    # BN sits between LeakyReLU and the next Linear).
    w2_f = s1[:, None] * params["w2"]
    b2_f = params["b2"] + t1 @ params["w2"]
    w3_f = s2[:, None] * params["w3"]
    b3_f = params["b3"] + t2 @ params["w3"]

    # Feature-major weights, bf16 for the MXU; hidden biases in the epilogue
    # dtype, final bias in f32 (logits stay f32 for the softmax).
    w1t = params["w1"].T.astype(jnp.bfloat16)                 # (H, L)
    w2t = w2_f.T.astype(jnp.bfloat16)                         # (H, H)
    w3t = w3_f.T.astype(jnp.bfloat16)                         # (C, H)
    b1c = params["b1"].reshape(HIDDEN_DIMS, 1).astype(epilogue_dtype)
    b2c = b2_f.reshape(HIDDEN_DIMS, 1).astype(epilogue_dtype)
    b3c = b3_f.reshape(CLASS_NUM, 1).astype(jnp.float32)

    grid = (n_pad // tile_n,)

    def const_spec(shape):
        return pl.BlockSpec(shape, lambda i: (0, 0))

    kernel = functools.partial(_discnet_kernel, act_dtype=epilogue_dtype)

    out_t = pl.pallas_call(
        kernel,
        out_shape=jax.ShapeDtypeStruct((CLASS_NUM, n_pad), jnp.float32),
        grid_spec=pltpu.PrefetchScalarGridSpec(
            num_scalar_prefetch=0,
            grid=grid,
            in_specs=[
                pl.BlockSpec((LATENT_DIMS, tile_n), lambda i: (0, i)),   # x
                const_spec((HIDDEN_DIMS, LATENT_DIMS)),                  # w1t
                const_spec((HIDDEN_DIMS, 1)),                            # b1
                const_spec((HIDDEN_DIMS, HIDDEN_DIMS)),                  # w2t
                const_spec((HIDDEN_DIMS, 1)),                            # b2
                const_spec((CLASS_NUM, HIDDEN_DIMS)),                    # w3t
                const_spec((CLASS_NUM, 1)),                              # b3
            ],
            out_specs=pl.BlockSpec((CLASS_NUM, tile_n), lambda i: (0, i)),
        ),
        compiler_params=pltpu.CompilerParams(
            dimension_semantics=("parallel",),
        ),
    )(xt, w1t, b1c, w2t, b2c, w3t, b3c)

    out_t = out_t[:, :n]                      # drop padded nodes
    if out_layout == "cn":
        return out_t                          # (C, N): no extra HBM round-trip
    return out_t.T                            # (N, C): PyTorch-compatible


def init_params(key):
    """Deterministic parameter init mimicking PyTorch Linear default
    (uniform in +/- 1/sqrt(fan_in)) and BatchNorm1d defaults."""
    ks = jax.random.split(key, 6)

    def lin(kw, kb, fan_in, fan_out):
        bound = 1.0 / jnp.sqrt(float(fan_in))
        w = jax.random.uniform(kw, (fan_in, fan_out), jnp.float32, -bound, bound)
        b = jax.random.uniform(kb, (fan_out,), jnp.float32, -bound, bound)
        return w, b

    w1, b1 = lin(ks[0], ks[1], LATENT_DIMS, HIDDEN_DIMS)
    w2, b2 = lin(ks[2], ks[3], HIDDEN_DIMS, HIDDEN_DIMS)
    w3, b3 = lin(ks[4], ks[5], HIDDEN_DIMS, CLASS_NUM)

    return {
        "w1": w1, "b1": b1,
        "bn1_gamma": jnp.ones((HIDDEN_DIMS,), jnp.float32),
        "bn1_beta": jnp.zeros((HIDDEN_DIMS,), jnp.float32),
        "bn1_mean": jnp.zeros((HIDDEN_DIMS,), jnp.float32),
        "bn1_var": jnp.ones((HIDDEN_DIMS,), jnp.float32),
        "w2": w2, "b2": b2,
        "bn2_gamma": jnp.ones((HIDDEN_DIMS,), jnp.float32),
        "bn2_beta": jnp.zeros((HIDDEN_DIMS,), jnp.float32),
        "bn2_mean": jnp.zeros((HIDDEN_DIMS,), jnp.float32),
        "bn2_var": jnp.ones((HIDDEN_DIMS,), jnp.float32),
        "w3": w3, "b3": b3,
    }


def reference_forward(x, params):
    """Pure-JAX f32 reference (eval-mode PyTorch semantics)."""
    def fold_bn(gamma, beta, mean, var):
        scale = gamma / jnp.sqrt(var + BN_EPS)
        return scale, beta - mean * scale

    s1, t1 = fold_bn(params["bn1_gamma"], params["bn1_beta"],
                     params["bn1_mean"], params["bn1_var"])
    s2, t2 = fold_bn(params["bn2_gamma"], params["bn2_beta"],
                     params["bn2_mean"], params["bn2_var"])

    h = x @ params["w1"] + params["b1"]
    h = jnp.where(h > 0, h, LEAKY_SLOPE * h)
    h = h * s1 + t1
    h = h @ params["w2"] + params["b2"]
    h = jnp.where(h > 0, h, LEAKY_SLOPE * h)
    h = h * s2 + t2
    logits = h @ params["w3"] + params["b3"]
    return jax.nn.softmax(logits, axis=1)


if __name__ == "__main__":
    key = jax.random.PRNGKey(0)
    k_param, k_x = jax.random.split(key)

    params = init_params(k_param)

    N = 2500  # number of spots / nodes (not a multiple of 128 -> exercises padding)
    x = jax.random.normal(k_x, (N, LATENT_DIMS), jnp.float32)

    y = discnet_forward(x, params)
    y = jax.block_until_ready(y)

    y_ref = reference_forward(x, params)
    assert y.shape == (N, CLASS_NUM)

    diff = jnp.abs(y - y_ref)
    # bf16 matmul operands + bf16 elementwise epilogue => loosened tolerance.
    assert float(jnp.max(diff)) < 5e-2, "max prob error vs f32 reference too large"
    assert float(jnp.mean(diff)) < 1e-2, "mean prob error vs f32 reference too large"
    # Exact softmax divide -> rows sum to 1 to f32 rounding.
    assert jnp.allclose(jnp.sum(y, axis=1), jnp.ones((N,)), atol=1e-3)

    print("KERNEL_OK")
</pallas_src>

<mosaic_0001>
module attributes {stable_mosaic.version = 11 : i64} {
  func.func @_discnet_kernel(%arg0: i32, %arg1: memref<8x1280xbf16, #tpu.memory_space<vmem>>, %arg2: memref<64x8xbf16, #tpu.memory_space<vmem>>, %arg3: memref<64x1xbf16, #tpu.memory_space<vmem>>, %arg4: memref<64x64xbf16, #tpu.memory_space<vmem>>, %arg5: memref<64x1xbf16, #tpu.memory_space<vmem>>, %arg6: memref<4x64xbf16, #tpu.memory_space<vmem>>, %arg7: memref<4x1xf32, #tpu.memory_space<vmem>>, %arg8: memref<4x1280xf32, #tpu.memory_space<vmem>>) attributes {dimension_semantics = [#tpu.dimension_semantics<parallel>], iteration_bounds = array<i64: 2>, scalar_prefetch = 0 : i64, scratch_operands = 0 : i64, tpu.core_type = #tpu.core_type<tc>, window_params = [{transform_indices = @transform_0, window_bounds = array<i64: 8, 1280>}, {pipeline_mode = #tpu.pipeline_mode<synchronous>, transform_indices = @transform_1, window_bounds = array<i64: 64, 8>}, {pipeline_mode = #tpu.pipeline_mode<synchronous>, transform_indices = @transform_2, window_bounds = array<i64: 64, 1>}, {pipeline_mode = #tpu.pipeline_mode<synchronous>, transform_indices = @transform_3, window_bounds = array<i64: 64, 64>}, {pipeline_mode = #tpu.pipeline_mode<synchronous>, transform_indices = @transform_4, window_bounds = array<i64: 64, 1>}, {pipeline_mode = #tpu.pipeline_mode<synchronous>, transform_indices = @transform_5, window_bounds = array<i64: 4, 64>}, {pipeline_mode = #tpu.pipeline_mode<synchronous>, transform_indices = @transform_6, window_bounds = array<i64: 4, 1>}, {transform_indices = @transform_7, window_bounds = array<i64: 4, 1280>}]} {
    %c0 = arith.constant 0 : index
    %c0_0 = arith.constant 0 : index
    %0 = vector.load %arg2[%c0, %c0_0] : memref<64x8xbf16, #tpu.memory_space<vmem>>, vector<64x8xbf16>
    %c0_1 = arith.constant 0 : index
    %c0_2 = arith.constant 0 : index
    %1 = vector.load %arg1[%c0_1, %c0_2] : memref<8x1280xbf16, #tpu.memory_space<vmem>>, vector<8x1280xbf16>
    %cst = arith.constant dense<0.000000e+00> : vector<64x1280xf32>
    %2 = tpu.matmul %0, %1, %cst {dimension_numbers = #tpu.dot_dimension_numbers<[1], [0], [0], [1], [0, 0, 1, 1], [], []>} : vector<64x8xbf16>, vector<8x1280xbf16>, vector<64x1280xf32> -> vector<64x1280xf32>
    %3 = arith.truncf %2 : vector<64x1280xf32> to vector<64x1280xbf16>
    %c0_3 = arith.constant 0 : index
    %c0_4 = arith.constant 0 : index
    %4 = vector.load %arg3[%c0_3, %c0_4] : memref<64x1xbf16, #tpu.memory_space<vmem>>, vector<64x1xbf16>
    %5 = vector.broadcast %4 : vector<64x1xbf16> to vector<64x1280xbf16>
    %6 = arith.addf %3, %5 : vector<64x1280xbf16>
    %cst_5 = arith.constant 1.000980e-02 : bf16
    %7 = vector.broadcast %cst_5 : bf16 to vector<64x1280xbf16>
    %8 = arith.mulf %7, %6 : vector<64x1280xbf16>
    %9 = arith.maximumf %6, %8 : vector<64x1280xbf16>
    %c0_6 = arith.constant 0 : index
    %c0_7 = arith.constant 0 : index
    %10 = vector.load %arg4[%c0_6, %c0_7] : memref<64x64xbf16, #tpu.memory_space<vmem>>, vector<64x64xbf16>
    %cst_8 = arith.constant dense<0.000000e+00> : vector<64x1280xf32>
    %11 = tpu.matmul %10, %9, %cst_8 {dimension_numbers = #tpu.dot_dimension_numbers<[1], [0], [0], [1], [0, 0, 1, 1], [], []>} : vector<64x64xbf16>, vector<64x1280xbf16>, vector<64x1280xf32> -> vector<64x1280xf32>
    %12 = arith.truncf %11 : vector<64x1280xf32> to vector<64x1280xbf16>
    %c0_9 = arith.constant 0 : index
    %c0_10 = arith.constant 0 : index
    %13 = vector.load %arg5[%c0_9, %c0_10] : memref<64x1xbf16, #tpu.memory_space<vmem>>, vector<64x1xbf16>
    %14 = vector.broadcast %13 : vector<64x1xbf16> to vector<64x1280xbf16>
    %15 = arith.addf %12, %14 : vector<64x1280xbf16>
    %cst_11 = arith.constant 1.000980e-02 : bf16
    %16 = vector.broadcast %cst_11 : bf16 to vector<64x1280xbf16>
    %17 = arith.mulf %16, %15 : vector<64x1280xbf16>
    %18 = arith.maximumf %15, %17 : vector<64x1280xbf16>
    %c0_12 = arith.constant 0 : index
    %c0_13 = arith.constant 0 : index
    %19 = vector.load %arg6[%c0_12, %c0_13] : memref<4x64xbf16, #tpu.memory_space<vmem>>, vector<4x64xbf16>
    %cst_14 = arith.constant dense<0.000000e+00> : vector<4x1280xf32>
    %20 = tpu.matmul %19, %18, %cst_14 {dimension_numbers = #tpu.dot_dimension_numbers<[1], [0], [0], [1], [0, 0, 1, 1], [], []>} : vector<4x64xbf16>, vector<64x1280xbf16>, vector<4x1280xf32> -> vector<4x1280xf32>
    %c0_15 = arith.constant 0 : index
    %c0_16 = arith.constant 0 : index
    %21 = vector.load %arg7[%c0_15, %c0_16] : memref<4x1xf32, #tpu.memory_space<vmem>>, vector<4x1xf32>
    %22 = vector.broadcast %21 : vector<4x1xf32> to vector<4x1280xf32>
    %23 = arith.addf %20, %22 : vector<4x1280xf32>
    %cst_17 = arith.constant dense<0xFF800000> : vector<1280xf32>
    %24 = vector.multi_reduction <maximumf>, %23, %cst_17 [0] : vector<4x1280xf32> to vector<1280xf32>
    %25 = vector.shape_cast %24 : vector<1280xf32> to vector<1x1280xf32>
    %26 = vector.broadcast %25 : vector<1x1280xf32> to vector<4x1280xf32>
    %27 = arith.subf %23, %26 : vector<4x1280xf32>
    %28 = math.exp %27 : vector<4x1280xf32>
    %cst_18 = arith.constant dense<0.000000e+00> : vector<1280xf32>
    %29 = vector.multi_reduction <add>, %28, %cst_18 [0] : vector<4x1280xf32> to vector<1280xf32>
    %30 = vector.shape_cast %29 : vector<1280xf32> to vector<1x1280xf32>
    %31 = vector.broadcast %30 : vector<1x1280xf32> to vector<4x1280xf32>
    %32 = arith.divf %28, %31 : vector<4x1280xf32>
    %c0_19 = arith.constant 0 : index
    %c0_20 = arith.constant 0 : index
    %33 = vector.load %arg8[%c0_19, %c0_20] : memref<4x1280xf32, #tpu.memory_space<vmem>>, vector<4x1280xf32>
    tpu.vector_store %arg8[%c0_19, %c0_20], %32 {strides = array<i32>} : memref<4x1280xf32, #tpu.memory_space<vmem>>, vector<4x1280xf32>,
    return
  }
  func.func @transform_0(%arg0: i32) -> (i32, i32) {
    %c0_i32 = arith.constant 0 : i32
    %c0_i32_0 = arith.constant 0 : i32
    return %c0_i32, %arg0 : i32, i32
  }
  func.func @transform_1(%arg0: i32) -> (i32, i32) {
    %c0_i32 = arith.constant 0 : i32
    %c0_i32_0 = arith.constant 0 : i32
    %c0_i32_1 = arith.constant 0 : i32
    return %c0_i32, %c0_i32_0 : i32, i32
  }
  func.func @transform_2(%arg0: i32) -> (i32, i32) {
    %c0_i32 = arith.constant 0 : i32
    %c0_i32_0 = arith.constant 0 : i32
    %c0_i32_1 = arith.constant 0 : i32
    return %c0_i32, %c0_i32_0 : i32, i32
  }
  func.func @transform_3(%arg0: i32) -> (i32, i32) {
    %c0_i32 = arith.constant 0 : i32
    %c0_i32_0 = arith.constant 0 : i32
    %c0_i32_1 = arith.constant 0 : i32
    return %c0_i32, %c0_i32_0 : i32, i32
  }
  func.func @transform_4(%arg0: i32) -> (i32, i32) {
    %c0_i32 = arith.constant 0 : i32
    %c0_i32_0 = arith.constant 0 : i32
    %c0_i32_1 = arith.constant 0 : i32
    return %c0_i32, %c0_i32_0 : i32, i32
  }
  func.func @transform_5(%arg0: i32) -> (i32, i32) {
    %c0_i32 = arith.constant 0 : i32
    %c0_i32_0 = arith.constant 0 : i32
    %c0_i32_1 = arith.constant 0 : i32
    return %c0_i32, %c0_i32_0 : i32, i32
  }
  func.func @transform_6(%arg0: i32) -> (i32, i32) {
    %c0_i32 = arith.constant 0 : i32
    %c0_i32_0 = arith.constant 0 : i32
    %c0_i32_1 = arith.constant 0 : i32
    return %c0_i32, %c0_i32_0 : i32, i32
  }
  func.func @transform_7(%arg0: i32) -> (i32, i32) {
    %c0_i32 = arith.constant 0 : i32
    %c0_i32_0 = arith.constant 0 : i32
    return %c0_i32, %arg0 : i32, i32
  }
}

</mosaic_0001>

<bundles_post_ra>
// kernel: tpu_custom_call.1
= control target key start
LH: loop header
LB: loop body
LE: loop exit
PB: predicated region body
PF: predicated region fallthrough
CT: control target
= control target key end

     0   :  { %12 = vsyncpa [#allocation3], 0  ;;  %s3249_s0 = inlined_call_operand.vmem [shape: bf16[8,2560], index: 0, kind: input, shape index: {}]   ;;  %s3250_s1 = inlined_call_operand.vmem [shape: bf16[64,8], index: 1, kind: input, shape index: {}]   ;;  %s3251_s2 = inlined_call_operand.vmem [shape: bf16[64,1], index: 2, kind: input, shape index: {}]   ;;  %s3252_s3 = inlined_call_operand.vmem [shape: bf16[64,64], index: 3, kind: input, shape index: {}]   ;;  %s3253_s4 = inlined_call_operand.vmem [shape: bf16[64,1], index: 4, kind: input, shape index: {}]   ;;  %s3254_s5 = inlined_call_operand.vmem [shape: bf16[4,64], index: 5, kind: input, shape index: {}]   ;;  %s3255_s6 = inlined_call_operand.vmem [shape: f32[4,1], index: 6, kind: input, shape index: {}]   ;;  %s3256_s7 = inlined_call_operand.hbm [shape: f32[4,2560], index: 7, kind: output, shape index: {}]  }
   0x1   :  { %14 = vsyncpa [#allocation3 + $0x1], 0  ;;  %s2529_s24 = smov 0   ;;  %s2531_s25 = smov 0  }
   0x2   :  { %s2533_s26 = smov 0   ;;  %s2535_s27 = smov 0  }
   0x3 LB: > { %s2550_s28 = sadd.s32 4294967295, %s2484_s27   ;;  %s2235_s29 = sadd.s32 4294967294, %s2484_s27   ;;  %s2484_s27 = sphi %s2535_s27, %s3262_s27   ;;  %s2480_s26 = sphi %s2533_s26, %s3261_s26   ;;  %s2476_s25 = sphi %s2531_s25, %s3260_s25   ;;  %s2472_s24 = sphi %s2529_s24, %s3259_s24  }
   0x4   : > { %s2554_s30 = sadd.s32 1, %s2484_s27   ;;  %s179_s8 = sadd.s32 1, %s2480_s26 }
   0x5   : > { %s176_s9 = ssub.s32 %s2484_s27, %s2554_s30  ;;  %p189_p0 = scmp.ne.s32.totalorder %s2480_s26, %s2476_s25 }
   0x6   : > { %p177_p1 = scmp.eq.s32.totalorder %s176_s9, 0  ;;  %p190_p2 = scmp.eq.s32.totalorder %s2550_s28, 1 }
   0x7   : > { %p195_p3 = scmp.ne.s32.totalorder %s2476_s25, %s2472_s24  ;;  %p196_p4 = scmp.eq.s32.totalorder %s2235_s29, 1 }
   0x8   : > { %s2565_s10 = scalar_select %p177_p1, %s2480_s26, %s179_s8  }
   0x9   : > { %p2567_p5 = por %p190_p2, %p189_p0  ;;  %p2571_p6 = por %p196_p4, %p195_p3 }
   0xa   : > { %p2238_p7 = scmp.ge.s32.totalorder %s2484_s27, 1  ;;  %p241_p8 = scmp.lt.s32.totalorder %s2484_s27, 3 }
   0xc   : > { %p242_p9 = pnand %p2238_p7, %p241_p8 }
   0xd   : > { %s273_s13 = smul.u32 (!%p242_p9), 10, %s2550_s28  ;;  %s270_s14 = sand.u32 (!%p242_p9), 1, %s2476_s25  }
   0xe   : > { %245 = sbr.rel (%p242_p9) target bundleno = 854 (0x356), region = 48  ;;  %s2162_s22 = scalar_lea.sflag (!%p242_p9), [#allocation3], %s270_s14 }
   0xf   : > { %p274_p10 = scmp.lt.s32.totalorder (!%p242_p9), %s273_s13, 19  ;;  %s2322_s15 = smul.u32 (!%p242_p9), 40, %s270_s14 }
  0x10   : > { %s2319_s17 = smul.u32 (!%p242_p9), 640, %s2550_s28  ;;  %s2488_s29 = smov (!%p242_p9), [#allocation2]  }
  0x11   : > { %s3186_s16 = scalar_lea.vmem (!%p242_p9), [#allocation2], %s2322_s15  ;;  %s2428_s28 = sshll.u32 (!%p242_p9), %s2488_s29, 4  ;;  %s2429_s28 = int_to_ptr.vmem [resolvable:$false] %s2428_s28 }
  0x12   : > { %s2174_s21 = scalar_lea.hbm (!%p242_p9), %s3256_s7, %s2319_s17  ;;  %s2430_s8 = scalar_lea.vmem (!%p242_p9), %s2429_s28, 1280 }
  0x13   : > { %v2486_v0 = vmov 0   ;;  %s3264_s13 = smov (!%p274_p10, %s273_s13), 19  ;;  %v795_v1 = vld [vmem:[%s3251_s2 + $0x18] sm:$0xf]  ;;  %v793_v2 = vld [vmem:[%s3251_s2 + $0x10] sm:$0xf]  ;;  %v805_v44 = vlaneseq }
  0x14   : > { %416 = vmatprep.mubr.bf16.mxu0 %v2486_v0  ;;  %446 = vmatprep.mubr.bf16.mxu1 %v2486_v0  ;;  %s2239_s18 = sshll.u32 %s3264_s13, 2  ;;  %v796_v3 = vld [vmem:[%s3251_s2 + $0x1c] sm:$0xf]  ;;  %v794_v4 = vld [vmem:[%s3251_s2 + $0x14] sm:$0xf]  ;;  %vm353_vm0 = vcmask 1043456  }
  0x15   : > { %2364 = vset.pattern.permute.xlu0 %v2486_v0  ;;  %2365 = vset.pattern.permute.xlu1 %v2486_v0  ;;  %s277_s23 = scalar_lea.vmem %s3249_s0, %s2239_s18  ;;  %v2600_v12 = vld [vmem:[%s3250_s1] sm:$0xff]   ;;  %v2605_v13 = vld [vmem:[%s3250_s1 + $0x18] sm:$0xff]   ;;  %v791_v16 = vld [vmem:[%s3251_s2 + $0x8] sm:$0xf]  ;;  %vm340_vm1 = vcmask 64512   ;;  %v806_v47 = vshrl.u32 %v805_v44, 7 }
  0x16   : > { %871 = vperm.xlu0 %2364, %v795_v1   ;;  %847 = vperm.xlu1 %2365, %v793_v2   ;;  %v290_v5 = vld [vmem:[%s277_s23] sm:$0xff]  ;;  %v291_v6 = vld [vmem:[%s277_s23 + $0x8] sm:$0xff]  ;;  %v292_v7 = vld [vmem:[%s277_s23 + $0x10] sm:$0xff]  ;;  %v2487_v42 = vmov 839922192   ;;  %vm1065_vm2 = vcmask 523264  }
  0x17   : > { %v2245_v8 = vcombine.high %v290_v5, %v290_v5  ;;  %v2244_v9 = vcombine.low %v290_v5, %v290_v5  ;;  %v2247_v10 = vcombine.high %v291_v6, %v291_v6  ;;  %v2246_v11 = vcombine.low %v291_v6, %v291_v6  ;;  %v293_v18 = vld [vmem:[%s277_s23 + $0x18] sm:$0xff]  ;;  %v294_v19 = vld [vmem:[%s277_s23 + $0x20] sm:$0xff]  ;;  %v792_v20 = vld [vmem:[%s3251_s2 + $0xc] sm:$0xf]  ;;  %s2176_s18 = sshll.u32 %s3186_s16, 4  ;;  %s2177_s18 = int_to_ptr.vmem [resolvable:$true] %s2176_s18 }
  0x18   : > { %v2249_v14 = vcombine.high %v292_v7, %v292_v7  ;;  %v2248_v15 = vcombine.low %v292_v7, %v292_v7  ;;  %v2251_v23 = vcombine.high %v293_v18, %v293_v18  ;;  %v2253_v24 = vcombine.high %v294_v19, %v294_v19  ;;  %v789_v25 = vld [vmem:[%s3251_s2] sm:$0xf]  ;;  %v790_v26 = vld [vmem:[%s3251_s2 + $0x4] sm:$0xf]  ;;  %v2372_v28 = vld [vmem:[%s3250_s1 + $0x8] sm:$0xff]   ;;  %s2424_s23 = scalar_lea.vmem %s2177_s18, 640  ;;  %p2431_p0 = scmp.lt.s32.totalorder %s2177_s18, %s2429_s28 }
  0x19   : > { %2254 = vmatprep.subr.msk.bf16.mxu0 %vm353_vm0, %v2245_v8  ;;  %2320 = vmatprep.subr.msk.bf16.mxu1 %vm353_vm0, %v2245_v8  ;;  %v355_v17 = vsel %vm353_vm0, %v2244_v9, 0  ;;  %v361_v21 = vsel %vm353_vm0, %v2246_v11, 0  ;;  %v2250_v27 = vcombine.low %v293_v18, %v293_v18  ;;  %v1489_v30 = vld [vmem:[%s3253_s4 + $0x18] sm:$0xf]  ;;  %v1490_v31 = vld [vmem:[%s3253_s4 + $0x1c] sm:$0xf]  ;;  %v2252_v37 = vcombine.low %v294_v19, %v294_v19  ;;  %p2425_p11 = scmp.ne.s32.totalorder %s2177_s18, %s2424_s23  ;;  %p2432_p1 = scmp.lt.s32.totalorder %s2430_s8, %s2424_s23 }
  0x1a   : > { %883 = vperm.xlu0 %2364, %v796_v3   ;;  %859 = vperm.xlu1 %2365, %v794_v4   ;;  %v367_v22 = vsel %vm353_vm0, %v2248_v15, 0  ;;  %v1487_v32 = vld [vmem:[%s3253_s4 + $0x10] sm:$0xf]  ;;  %v1488_v34 = vld [vmem:[%s3253_s4 + $0x14] sm:$0xf]  ;;  %v803_v43 = vunpack.c.l.s4 %v2487_v42 }
  0x1b   : > { %399 = vmatpush1.bf16.msra.mxu0 %v355_v17  ;;  %2321 = vmatpush1.bf16.msra.mxu1 %v355_v17  ;;  %v373_v29 = vsel %vm353_vm0, %v2250_v27, 0  ;;  %v2373_v33 = vld [vmem:[%s3250_s1 + $0x10] sm:$0xff]   ;;  %v1485_v35 = vld [vmem:[%s3253_s4 + $0x8] sm:$0xf]  ;;  %v1486_v36 = vld [vmem:[%s3253_s4 + $0xc] sm:$0xf]  ;;  %p2426_p12 = pnand %p2425_p11, %p2567_p5  ;;  %p2433_p2 = por %p2432_p1, %p2431_p0 }
  0x1c   : > { %2259 = vmatprep.subr.msk.bf16.mxu1 %vm353_vm0, %v2247_v10  ;;  %2264 = vmatprep.subr.msk.bf16.mxu0 %vm353_vm0, %v2249_v14  ;;  %v1483_v38 = vld [vmem:[%s3253_s4] sm:$0xf]  ;;  %v1484_v39 = vld [vmem:[%s3253_s4 + $0x4] sm:$0xf]  ;;  %v379_v40 = vsel %vm353_vm0, %v2252_v37, 0  ;;  %v804_v46 = vunpack.c.0.s8 %v803_v43 }
  0x1d   : > { %v1732_v41 = vld [vmem:[%s3255_s6] sm:$0xf]  ;;  %p2427_p13 = pneg %p2426_p12 }
  0x1e   : > { %823 = vperm.xlu0 %2364, %v791_v16   ;;  %835 = vperm.xlu1 %2365, %v792_v20   ;;  %v2713_v48 = vsub.s32 %v804_v46, %v806_v47 }
  0x1f   : > { %2255 = vmatmul.mubr.msk.bf16.vlgmr.msra.gmra.mxu0 %vm340_vm1, %v2600_v12  ;;  %2258 = vmatmul.mubr.msk.bf16.vlgmr.msra.gmra.mxu1 %vm340_vm1, %v2605_v13  ;;  %p2434_p3 = pnand %p2433_p2, %p2427_p13 }
  0x20   : > { %472 = vmatpush1.bf16.msra.mxu1 %v361_v21  ;;  %426 = vmatprep.mubr.bf16.mxu0 %v2486_v0 }
  0x21   : > { %489 = vmatprep.mubr.bf16.mxu1 %v2486_v0  ;;  %545 = vmatpush1.bf16.msra.mxu0 %v367_v22 }
  0x22   : > { %2269 = vmatprep.subr.msk.bf16.mxu1 %vm353_vm0, %v2251_v23  ;;  %2274 = vmatprep.subr.msk.bf16.mxu0 %vm353_vm0, %v2253_v24 }
  0x23   : > { %799 = vperm.xlu0 %2364, %v789_v25   ;;  %811 = vperm.xlu1 %2365, %v790_v26  }
  0x27   : > { %2256 = vmatmul.mubr.msk.bf16.gmra.mxu0 %vm340_vm1, %v2372_v28  ;;  %2260 = vmatmul.mubr.msk.bf16.vlgmr.msra.gmra.mxu1 %vm340_vm1, %v2600_v12 }
  0x28   : > { %436 = vmatprep.mubr.bf16.mxu0 %v2486_v0  ;;  %499 = vmatprep.mubr.bf16.mxu1 %v2486_v0 }
  0x29   : > { %618 = vmatpush1.bf16.msra.mxu1 %v373_v29  ;;  %1565 = vperm.xlu0 %2364, %v1489_v30  }
  0x2a   : > { %1577 = vperm.xlu1 %2365, %v1490_v31  }
  0x2d   : > { %1541 = vperm.xlu0 %2364, %v1487_v32  }
  0x2e   : > { %1553 = vperm.xlu1 %2365, %v1488_v34  }
  0x2f   : > { %2257 = vmatmul.mubr.msk.bf16.gmra.mxu0 %vm340_vm1, %v2373_v33  ;;  %2261 = vmatmul.mubr.msk.bf16.gmra.mxu1 %vm340_vm1, %v2372_v28 }
  0x30   : > { %509 = vmatprep.mubr.bf16.mxu1 %v2486_v0  ;;  %562 = vmatprep.mubr.bf16.mxu0 %v2486_v0 }
  0x31   : > { %1517 = vperm.xlu0 %2364, %v1485_v35  }
  0x32   : > { %1529 = vperm.xlu1 %2365, %v1486_v36  }
  0x35   : > { %1493 = vperm.xlu0 %2364, %v1483_v38  }
  0x36   : > { %1505 = vperm.xlu1 %2365, %v1484_v39  }
  0x37   : > { %2262 = vmatmul.mubr.msk.bf16.gmra.mxu1 %vm340_vm1, %v2373_v33  ;;  %2265 = vmatmul.mubr.msk.bf16.vlgmr.msra.gmra.mxu0 %vm340_vm1, %v2600_v12 }
  0x38   : > { %519 = vmatprep.mubr.bf16.mxu1 %v2486_v0  ;;  %572 = vmatprep.mubr.bf16.mxu0 %v2486_v0 }
  0x39   : > { %691 = vmatpush1.bf16.msra.mxu0 %v379_v40  ;;  %1735 = vperm.xlu0 %2364, %v1732_v41  }
  0x3f   : > { %2263 = vmatmul.mubr.msk.bf16.gmra.mxu1 %vm340_vm1, %v2605_v13  ;;  %2266 = vmatmul.mubr.msk.bf16.gmra.mxu0 %vm340_vm1, %v2372_v28 }
  0x40   : > { %582 = vmatprep.mubr.bf16.mxu0 %v2486_v0  ;;  %635 = vmatprep.mubr.bf16.mxu1 %v2486_v0 }
  0x47   : > { %2267 = vmatmul.mubr.msk.bf16.gmra.mxu0 %vm340_vm1, %v2373_v33  ;;  %2270 = vmatmul.mubr.msk.bf16.vlgmr.msra.gmra.mxu1 %vm340_vm1, %v2600_v12 }
  0x48   : > { %592 = vmatprep.mubr.bf16.mxu0 %v2486_v0  ;;  %645 = vmatprep.mubr.bf16.mxu1 %v2486_v0 }
  0x4f   : > { %2268 = vmatmul.mubr.msk.bf16.gmra.mxu0 %vm340_vm1, %v2605_v13  ;;  %2271 = vmatmul.mubr.msk.bf16.gmra.mxu1 %vm340_vm1, %v2372_v28 }
  0x50   : > { %655 = vmatprep.mubr.bf16.mxu1 %v2486_v0  ;;  %708 = vmatprep.mubr.bf16.mxu0 %v2486_v0 }
  0x57   : > { %2272 = vmatmul.mubr.msk.bf16.gmra.mxu1 %vm340_vm1, %v2373_v33  ;;  %2275 = vmatmul.mubr.msk.bf16.vlgmr.msra.gmra.mxu0 %vm340_vm1, %v2600_v12 }
  0x58   : > { %665 = vmatprep.mubr.bf16.mxu1 %v2486_v0  ;;  %718 = vmatprep.mubr.bf16.mxu0 %v2486_v0 }
  0x5f   : > { %2273 = vmatmul.mubr.msk.bf16.gmra.mxu1 %vm340_vm1, %v2605_v13  ;;  %2276 = vmatmul.mubr.msk.bf16.gmra.mxu0 %vm340_vm1, %v2372_v28 }
  0x60   : > { %728 = vmatprep.mubr.bf16.mxu0 %v2486_v0  ;;  %1110 = vmatprep.mubr.bf16.mxu1 %v2486_v0 }
  0x67   : > { %2277 = vmatmul.mubr.msk.bf16.gmra.mxu0 %vm340_vm1, %v2373_v33 }
  0x68   : > { %738 = vmatprep.mubr.bf16.mxu0 %v2486_v0 }
  0x6f   : > { %2278 = vmatmul.mubr.msk.bf16.gmra.mxu0 %vm340_vm1, %v2605_v13 }
  0x70   : > { %1183 = vmatprep.mubr.bf16.mxu0 %v2486_v0 }
  0x91   : > { %v872_v45 = vpop.permute.xlu0 %871  ;;  %v848_v54 = vpop.permute.xlu1 %847 }
  0x92   : > { %v880_v50 = vrot.slane %v872_v45, %v2713_v48  ;;  %v856_v18 = vrot.slane %v848_v54, %v2713_v48 }
  0x95   : > { %v884_v49 = vpop.permute.xlu0 %883  ;;  %v860_v63 = vpop.permute.xlu1 %859 }
  0x96   : > { %v892_v51 = vrot.slane %v884_v49, %v2713_v48  ;;  %v868_v19 = vrot.slane %v860_v63, %v2713_v48 }
  0x98   : > { %v2721_v57 = vcombine.low %v880_v50, %v892_v51  ;;  %v2743_v26 = vcombine.low %v856_v18, %v868_v19 }
  0x99   : > { %v824_v13 = vpop.permute.xlu0 %823  ;;  %v836_v14 = vpop.permute.xlu1 %835 }
  0x9a   : > { %v832_v22 = vrot.slane %v824_v13, %v2713_v48  ;;  %v844_v23 = vrot.slane %v836_v14, %v2713_v48 }
  0x9c   : > { %v2747_v32 = vcombine.low %v832_v22, %v844_v23 }
  0x9e   : > { %v800_v27 = vpop.permute.xlu0 %799  ;;  %v812_v28 = vpop.permute.xlu1 %811 }
  0x9f   : > { %v808_v33 = vrot.slane %v800_v27, %v2713_v48  ;;  %v820_v34 = vrot.slane %v812_v28, %v2713_v48 }
  0xa1   : > { %v2758_v45 = vcombine.low %v808_v33, %v820_v34 }
  0xdf   : > { %v2717_v52 = vpop.f32.mrf.mxu0  ;;  %v448_v53 = vpop.f32.mrf.mxu1 }
  0xe1   : > { %v2719_v55 = vpop.f32.mrf.mxu0  ;;  %v450_v56 = vpop.f32.mrf.mxu1 }
  0xe3   : > { %v2723_v58 = vpop.f32.mrf.mxu0  ;;  %v452_v59 = vpop.f32.mrf.mxu1 }
  0xe4   : > { %v779_v60 = vpack.c.bf16 %v452_v59, %v448_v53  ;;  %v749_v47 = vpack.c.bf16 %v2723_v58, %v2717_v52 }
  0xe5   : > { %v424_v61 = vpop.f32.mrf.mxu0  ;;  %v454_v62 = vpop.f32.mrf.mxu1 }
  0xe6   : > { %v947_v1 = vadd.bf16 %v2721_v57, %v779_v60  ;;  %v780_v2 = vpack.c.bf16 %v454_v62, %v450_v56  ;;  %v750_v39 = vpack.c.bf16 %v424_v61, %v2719_v55  ;;  %v917_v62 = vadd.bf16 %v2758_v45, %v749_v47 }
  0xe7   : > { %v428_v3 = vpop.f32.mrf.mxu0  ;;  %v2726_v4 = vpop.f32.mrf.mxu1 }
  0xe8   : > { %v987_v5 = vmul.bf16 1009007652, %v947_v1  ;;  %v948_v6 = vadd.bf16 %v2721_v57, %v780_v2  ;;  %v918_v54 = vadd.bf16 %v2758_v45, %v750_v39 }
  0xe9   : > { %v430_v7 = vpop.f32.mrf.mxu0  ;;  %v2729_v8 = vpop.f32.mrf.mxu1 }
  0xea   : > { %v988_v9 = vmul.bf16 1009007652, %v948_v6  ;;  %v1027_v10 = vmax.bf16 %v987_v5, %v947_v1  ;;  %v958_v58 = vmul.bf16 1009007652, %v918_v54 }
  0xeb   : > { %v432_v11 = vpop.f32.mrf.mxu0  ;;  %v2731_v12 = vpop.f32.mrf.mxu1 }
  0xec   : > { %v1028_v15 = vmax.bf16 %v988_v9, %v948_v6  ;;  %v759_v36 = vpack.c.bf16 %v432_v11, %v428_v3  ;;  %v998_v14 = vmax.bf16 %v958_v58, %v918_v54 }
  0xed   : > { %v434_v16 = vpop.f32.mrf.mxu0  ;;  %v2733_v17 = vpop.f32.mrf.mxu1 }
  0xee   : > { %1086 = vmatprep.subr.bf16.mxu1 %v1028_v15  ;;  %v760_v29 = vpack.c.bf16 %v434_v16, %v430_v7  ;;  %v927_v49 = vadd.bf16 %v2747_v32, %v759_v36  ;;  %v957_v7 = vmul.bf16 1009007652, %v917_v62 }
  0xef   : > { %v438_v20 = vpop.f32.mrf.mxu0  ;;  %v2737_v21 = vpop.f32.mrf.mxu1  ;;  %1087 = vmatpush1.bf16.msra.mxu1 %v1027_v10 }
  0xf0   : > { %v928_v40 = vadd.bf16 %v2747_v32, %v760_v29  ;;  %v967_v63 = vmul.bf16 1009007652, %v927_v49  ;;  %v997_v19 = vmax.bf16 %v957_v7, %v917_v62 }
  0xf1   : > { %v440_v24 = vpop.f32.mrf.mxu0  ;;  %v2741_v25 = vpop.f32.mrf.mxu1 }
  0xf2   : > { %v968_v55 = vmul.bf16 1009007652, %v928_v40  ;;  %v1007_v9 = vmax.bf16 %v967_v63, %v927_v49 }
  0xf3   : > { %v442_v30 = vpop.f32.mrf.mxu0  ;;  %v2745_v31 = vpop.f32.mrf.mxu1 }
  0xf4   : > { %v769_v35 = vpack.c.bf16 %v442_v30, %v438_v20  ;;  %v1008_v3 = vmax.bf16 %v968_v55, %v928_v40  ;;  %v2787_v30 = vld [vmem:[%s3252_s3] sm:$0xff]   ;;  %v752_v40 = vpack.c.bf16 %v2733_v17, %v2729_v8 }
  0xf5   : > { %v444_v37 = vpop.f32.mrf.mxu0  ;;  %v2751_v38 = vpop.f32.mrf.mxu1 }
  0xf6   : > { %v937_v41 = vadd.bf16 %v2743_v26, %v769_v35  ;;  %v770_v42 = vpack.c.bf16 %v444_v37, %v440_v24  ;;  %v762_v24 = vpack.c.bf16 %v2751_v38, %v2741_v25  ;;  %v761_v25 = vpack.c.bf16 %v2745_v31, %v2737_v21 }
  0xf7   : > { %v511_v43 = vpop.f32.mrf.mxu1  ;;  %v2756_v44 = vpop.f32.mrf.mxu0  ;;  %v751_v31 = vpack.c.bf16 %v2731_v12, %v2726_v4  ;;  %v920_v54 = vadd.bf16 %v2758_v45, %v752_v40 }
  0xf8   : > { %v938_v46 = vadd.bf16 %v2743_v26, %v770_v42  ;;  %v977_v50 = vmul.bf16 1009007652, %v937_v41  ;;  %v929_v49 = vadd.bf16 %v2747_v32, %v761_v25 }
  0xf9   : > { %v513_v51 = vpop.f32.mrf.mxu1  ;;  %v2764_v53 = vpop.f32.mrf.mxu0  ;;  %v919_v4 = vadd.bf16 %v2758_v45, %v751_v31  ;;  %v960_v58 = vmul.bf16 1009007652, %v920_v54 }
  0xfa   : > { %v978_v56 = vmul.bf16 1009007652, %v938_v46  ;;  %v1017_v1 = vmax.bf16 %v977_v50, %v937_v41  ;;  %v930_v41 = vadd.bf16 %v2747_v32, %v762_v24  ;;  %v969_v12 = vmul.bf16 1009007652, %v929_v49 }
  0xfb   : > { %v515_v59 = vpop.f32.mrf.mxu1  ;;  %v2767_v60 = vpop.f32.mrf.mxu0  ;;  %v1000_v24 = vmax.bf16 %v960_v58, %v920_v54 }
  0xfc   : > { %v1018_v61 = vmax.bf16 %v978_v56, %v938_v46  ;;  %v771_v20 = vpack.c.bf16 %v515_v59, %v511_v43  ;;  %v970_v55 = vmul.bf16 1009007652, %v930_v41  ;;  %v2816_v59 = vld [vmem:[%s3252_s3 + $0x8] sm:$0xff]  }
  0xfd   : > { %v517_v2 = vpop.f32.mrf.mxu1  ;;  %v2770_v52 = vpop.f32.mrf.mxu0 }
  0xfe   : > { %1088 = vmatprep.subr.bf16.mxu1 %v1018_v61  ;;  %v772_v13 = vpack.c.bf16 %v517_v2, %v513_v51  ;;  %v939_v36 = vadd.bf16 %v2743_v26, %v771_v20 }
  0xff   : > { %v521_v5 = vpop.f32.mrf.mxu1  ;;  %v2772_v6 = vpop.f32.mrf.mxu0  ;;  %1089 = vmatpush1.bf16.msra.mxu1 %v1017_v1 }
 0x100   : > { %1090 = vmatprep.subr.bf16.mxu1 %v1008_v3  ;;  %v940_v27 = vadd.bf16 %v2743_v26, %v772_v13  ;;  %v979_v50 = vmul.bf16 1009007652, %v939_v36  ;;  %v1010_v3 = vmax.bf16 %v970_v55, %v930_v41  ;;  %v959_v13 = vmul.bf16 1009007652, %v919_v4 }
 0x101   : > { %v523_v10 = vpop.f32.mrf.mxu1  ;;  %v2774_v11 = vpop.f32.mrf.mxu0 }
 0x102   : > { %v980_v42 = vmul.bf16 1009007652, %v940_v27  ;;  %v1019_v63 = vmax.bf16 %v979_v50, %v939_v36  ;;  %v999_v36 = vmax.bf16 %v959_v13, %v919_v4 }
 0x103   : > { %v525_v15 = vpop.f32.mrf.mxu1  ;;  %v2776_v16 = vpop.f32.mrf.mxu0  ;;  %1091 = vmatpush1.bf16.msra.mxu1 %v1007_v9 }
 0x104   : > { %v781_v18 = vpack.c.bf16 %v525_v15, %v521_v5  ;;  %1092 = vmatprep.subr.bf16.mxu1 %v998_v14  ;;  %v1020_v56 = vmax.bf16 %v980_v42, %v940_v27  ;;  %v1009_v14 = vmax.bf16 %v969_v12, %v929_v49  ;;  %v2835_v27 = vld [vmem:[%s3252_s3 + $0x10] sm:$0xff]   ;;  %v754_v42 = vpack.c.bf16 %v2770_v52, %v2764_v53  ;;  %v2868_v52 = vld [vmem:[%s3252_s3 + $0x18] sm:$0xff]  }
 0x105   : > { %v527_v22 = vpop.f32.mrf.mxu1  ;;  %v2778_v23 = vpop.f32.mrf.mxu0 }
 0x106   : > { %v949_v28 = vadd.bf16 %v2721_v57, %v781_v18  ;;  %v782_v29 = vpack.c.bf16 %v527_v22, %v523_v10  ;;  %v922_v54 = vadd.bf16 %v2758_v45, %v754_v42 }
 0x107   : > { %v2789_v33 = vpop.f32.mrf.mxu0  ;;  %v2791_v34 = vpop.f32.mrf.mxu1  ;;  %1093 = vmatpush1.bf16.msra.mxu1 %v997_v19 }
 0x108   : > { %v950_v35 = vadd.bf16 %v2721_v57, %v782_v29  ;;  %v989_v37 = vmul.bf16 1009007652, %v949_v28 }
 0x109   : > { %v586_v38 = vpop.f32.mrf.mxu0  ;;  %v2797_v39 = vpop.f32.mrf.mxu1 }
 0x10a   : > { %v990_v43 = vmul.bf16 1009007652, %v950_v35  ;;  %2287 = vmatmul.mubr.msk.bf16.vlgmr.msra.gmra.mxu1 %vm1065_vm2, %v2787_v30  ;;  %v1029_v8 = vmax.bf16 %v989_v37, %v949_v28  ;;  %v764_v28 = vpack.c.bf16 %v2778_v23, %v2774_v11  ;;  %v763_v37 = vpack.c.bf16 %v2776_v16, %v2772_v6 }
 0x10b   : > { %v588_v46 = vpop.f32.mrf.mxu0  ;;  %v2804_v47 = vpop.f32.mrf.mxu1  ;;  %1120 = vmatprep.mubr.bf16.mxu1 %v2486_v0  ;;  %v753_v16 = vpack.c.bf16 %v2767_v60, %v2756_v44 }
 0x10c   : > { %v1030_v21 = vmax.bf16 %v990_v43, %v950_v35  ;;  %v773_v19 = vpack.c.bf16 %v588_v46, %v2789_v33  ;;  %v932_v43 = vadd.bf16 %v2747_v32, %v764_v28  ;;  %v931_v49 = vadd.bf16 %v2747_v32, %v763_v37 }
 0x10d   : > { %v590_v17 = vpop.f32.mrf.mxu0  ;;  %v2810_v51 = vpop.f32.mrf.mxu1 }
 0x10e   : > { %1159 = vmatprep.subr.bf16.mxu0 %v1030_v21  ;;  %v774_v5 = vpack.c.bf16 %v590_v17, %v586_v38  ;;  %v941_v41 = vadd.bf16 %v2743_v26, %v773_v19  ;;  %v972_v55 = vmul.bf16 1009007652, %v932_v43  ;;  %v971_v4 = vmul.bf16 1009007652, %v931_v49 }
 0x10f   : > { %v594_v61 = vpop.f32.mrf.mxu0  ;;  %v2818_v62 = vpop.f32.mrf.mxu1  ;;  %1160 = vmatpush1.bf16.msra.mxu0 %v1029_v8 }
 0x110   : > { %1161 = vmatprep.subr.bf16.mxu0 %v1020_v56  ;;  %v942_v29 = vadd.bf16 %v2743_v26, %v774_v5  ;;  %v981_v17 = vmul.bf16 1009007652, %v941_v41 }
 0x111   : > { %v596_v1 = vpop.f32.mrf.mxu0  ;;  %v2821_v2 = vpop.f32.mrf.mxu1 }
 0x112   : > { %2288 = vmatmul.mubr.msk.bf16.gmra.mxu1 %vm1065_vm2, %v2816_v59  ;;  %v982_v46 = vmul.bf16 1009007652, %v942_v29 }
 0x113   : > { %v598_v7 = vpop.f32.mrf.mxu0  ;;  %v2825_v9 = vpop.f32.mrf.mxu1  ;;  %1162 = vmatpush1.bf16.msra.mxu0 %v1019_v63  ;;  %1130 = vmatprep.mubr.bf16.mxu1 %v2486_v0 }
 0x114   : > { %v783_v10 = vpack.c.bf16 %v598_v7, %v594_v61  ;;  %1163 = vmatprep.subr.bf16.mxu0 %v1010_v3  ;;  %v1022_v56 = vmax.bf16 %v982_v46, %v942_v29  ;;  %v921_v61 = vadd.bf16 %v2758_v45, %v753_v16  ;;  %v962_v3 = vmul.bf16 1009007652, %v922_v54 }
 0x115   : > { %v600_v15 = vpop.f32.mrf.mxu0  ;;  %v2828_v18 = vpop.f32.mrf.mxu1  ;;  %v755_v16 = vpack.c.bf16 %v2804_v47, %v2791_v34 }
 0x116   : > { %v951_v20 = vadd.bf16 %v2721_v57, %v783_v10  ;;  %v784_v22 = vpack.c.bf16 %v600_v15, %v596_v1  ;;  %v1021_v1 = vmax.bf16 %v981_v17, %v941_v41  ;;  %v1012_v10 = vmax.bf16 %v972_v55, %v932_v43 }
 0x117   : > { %v2840_v35 = vpop.f32.mrf.mxu1  ;;  %v2842_v25 = vpop.f32.mrf.mxu0  ;;  %1164 = vmatpush1.bf16.msra.mxu0 %v1009_v14  ;;  %v961_v14 = vmul.bf16 1009007652, %v921_v61  ;;  %v1011_v15 = vmax.bf16 %v971_v4, %v931_v49  ;;  %v1002_v37 = vmax.bf16 %v962_v3, %v922_v54  ;;  %v923_v34 = vadd.bf16 %v2758_v45, %v755_v16 }
 0x118   : > { %v952_v33 = vadd.bf16 %v2721_v57, %v784_v22  ;;  %1165 = vmatprep.subr.bf16.mxu0 %v1000_v24  ;;  %v991_v11 = vmul.bf16 1009007652, %v951_v20  ;;  %v766_v24 = vpack.c.bf16 %v2828_v18, %v2821_v2  ;;  %v765_v2 = vpack.c.bf16 %v2825_v9, %v2818_v62 }
 0x119   : > { %v659_v38 = vpop.f32.mrf.mxu1  ;;  %v2847_v40 = vpop.f32.mrf.mxu0 }
 0x11a   : > { %v992_v23 = vmul.bf16 1009007652, %v952_v33  ;;  %2289 = vmatmul.mubr.msk.bf16.gmra.mxu1 %vm1065_vm2, %v2835_v27  ;;  %v1031_v53 = vmax.bf16 %v991_v11, %v951_v20  ;;  %v934_v42 = vadd.bf16 %v2747_v32, %v766_v24  ;;  %v933_v62 = vadd.bf16 %v2747_v32, %v765_v2 }
 0x11b   : > { %v661_v21 = vpop.f32.mrf.mxu1  ;;  %v2855_v31 = vpop.f32.mrf.mxu0  ;;  %1166 = vmatpush1.bf16.msra.mxu0 %v999_v36  ;;  %1140 = vmatprep.mubr.bf16.mxu1 %v2486_v0 }
 0x11c   : > { %v1032_v6 = vmax.bf16 %v992_v23, %v952_v33  ;;  %v775_v19 = vpack.c.bf16 %v661_v21, %v2840_v35  ;;  %v756_v23 = vpack.c.bf16 %v2810_v51, %v2797_v39  ;;  %v973_v47 = vmul.bf16 1009007652, %v933_v62 }
 0x11d   : > { %v663_v50 = vpop.f32.mrf.mxu1  ;;  %v2861_v8 = vpop.f32.mrf.mxu0 }
 0x11e   : > { %2291 = vmatmul.mubr.msk.bf16.vlgmr.msra.gmra.mxu0 %vm1065_vm2, %v2787_v30  ;;  %1232 = vmatprep.subr.bf16.mxu1 %v1032_v6  ;;  %v776_v58 = vpack.c.bf16 %v663_v50, %v659_v38  ;;  %v1001_v38 = vmax.bf16 %v961_v14, %v921_v61  ;;  %v943_v18 = vadd.bf16 %v2743_v26, %v775_v19 }
 0x11f   : > { %v667_v44 = vpop.f32.mrf.mxu1  ;;  %v2871_v60 = vpop.f32.mrf.mxu0  ;;  %1193 = vmatprep.mubr.bf16.mxu0 %v2486_v0  ;;  %1233 = vmatpush1.bf16.msra.mxu1 %v1031_v53  ;;  %v924_v17 = vadd.bf16 %v2758_v45, %v756_v23  ;;  %v974_v53 = vmul.bf16 1009007652, %v934_v42 }
 0x120   : > { %1234 = vmatprep.subr.bf16.mxu1 %v1022_v56  ;;  %v944_v28 = vadd.bf16 %v2743_v26, %v776_v58  ;;  %v983_v9 = vmul.bf16 1009007652, %v943_v18  ;;  %v1013_v58 = vmax.bf16 %v973_v47, %v933_v62 }
 0x121   : > { %v669_v12 = vpop.f32.mrf.mxu1  ;;  %v2875_v63 = vpop.f32.mrf.mxu0  ;;  %v1014_v56 = vmax.bf16 %v974_v53, %v934_v42 }
 0x122   : > { %2290 = vmatmul.mubr.msk.bf16.gmra.mxu1 %vm1065_vm2, %v2868_v52  ;;  %v984_v43 = vmul.bf16 1009007652, %v944_v28  ;;  %v1023_v54 = vmax.bf16 %v983_v9, %v943_v18 }
 0x123   : > { %v671_v5 = vpop.f32.mrf.mxu1  ;;  %v2879_v7 = vpop.f32.mrf.mxu0  ;;  %1256 = vmatprep.mubr.bf16.mxu1 %v2486_v0  ;;  %1235 = vmatpush1.bf16.msra.mxu1 %v1021_v1  ;;  %v963_v1 = vmul.bf16 1009007652, %v923_v34 }
 0x124   : > { %v785_v13 = vpack.c.bf16 %v671_v5, %v667_v44  ;;  %1236 = vmatprep.subr.bf16.mxu1 %v1012_v10  ;;  %v1024_v39 = vmax.bf16 %v984_v43, %v944_v28  ;;  %v964_v44 = vmul.bf16 1009007652, %v924_v17  ;;  %v767_v28 = vpack.c.bf16 %v2879_v7, %v2871_v60 }
 0x125   : > { %v673_v20 = vpop.f32.mrf.mxu1  ;;  %v2883_v22 = vpop.f32.mrf.mxu0  ;;  %v1003_v24 = vmax.bf16 %v963_v1, %v923_v34 }
 0x126   : > { %v953_v29 = vadd.bf16 %v2721_v57, %v785_v13  ;;  %v786_v33 = vpack.c.bf16 %v673_v20, %v669_v12  ;;  %2292 = vmatmul.mubr.msk.bf16.gmra.mxu0 %vm1065_vm2, %v2816_v59  ;;  %v1004_v14 = vmax.bf16 %v964_v44, %v924_v17 }
 0x127   : > { %v2891_v36 = vpop.f32.mrf.mxu0  ;;  %1203 = vmatprep.mubr.bf16.mxu0 %v2486_v0  ;;  %1237 = vmatpush1.bf16.msra.mxu1 %v1011_v15  ;;  %v768_v15 = vpack.c.bf16 %v2883_v22, %v2875_v63 }
 0x128   : > { %v954_v35 = vadd.bf16 %v2721_v57, %v786_v33  ;;  %v993_v41 = vmul.bf16 1009007652, %v953_v29  ;;  %1238 = vmatprep.subr.bf16.mxu1 %v1002_v37  ;;  %v758_v33 = vpack.c.bf16 %v2861_v8, %v2847_v40 }
 0x129   : > { %v732_v11 = vpop.f32.mrf.mxu0 }
 0x12a   : > { %v994_v46 = vmul.bf16 1009007652, %v954_v35  ;;  %v1033_v49 = vmax.bf16 %v993_v41, %v953_v29 }
 0x12b   : > { %v734_v21 = vpop.f32.mrf.mxu0  ;;  %1239 = vmatpush1.bf16.msra.mxu1 %v1001_v38  ;;  %v935_v38 = vadd.bf16 %v2747_v32, %v767_v28 }
 0x12c   : > { %v1034_v6 = vmax.bf16 %v994_v46, %v954_v35  ;;  %v777_v5 = vpack.c.bf16 %v734_v21, %v2891_v36  ;;  %v936_v36 = vadd.bf16 %v2747_v32, %v768_v15  ;;  %v757_v35 = vpack.c.bf16 %v2855_v31, %v2842_v25 }
 0x12d   : > { %v736_v50 = vpop.f32.mrf.mxu0  ;;  %v975_v25 = vmul.bf16 1009007652, %v935_v38 }
 0x12e   : > { %2293 = vmatmul.mubr.msk.bf16.gmra.mxu0 %vm1065_vm2, %v2835_v27  ;;  %1305 = vmatprep.subr.bf16.mxu0 %v1034_v6  ;;  %v778_v61 = vpack.c.bf16 %v736_v50, %v732_v11  ;;  %v945_v29 = vadd.bf16 %v2743_v26, %v777_v5  ;;  %v976_v60 = vmul.bf16 1009007652, %v936_v36  ;;  %v925_v32 = vadd.bf16 %v2758_v45, %v757_v35  ;;  %v1578_v6 = vpop.permute.xlu1 %1577 }
 0x12f   : > { %2295 = vmatmul.mubr.msk.bf16.vlgmr.msra.gmra.mxu1 %vm1065_vm2, %v2787_v30  ;;  %v740_v51 = vpop.f32.mrf.mxu0  ;;  %1306 = vmatpush1.bf16.msra.mxu0 %v1033_v49  ;;  %v1015_v11 = vmax.bf16 %v975_v25, %v935_v38 }
 0x130   : > { %1307 = vmatprep.subr.bf16.mxu0 %v1024_v39  ;;  %1213 = vmatprep.mubr.bf16.mxu0 %v2486_v0  ;;  %v946_v19 = vadd.bf16 %v2743_v26, %v778_v61  ;;  %v985_v2 = vmul.bf16 1009007652, %v945_v29  ;;  %v926_v26 = vadd.bf16 %v2758_v45, %v758_v33  ;;  %v1016_v7 = vmax.bf16 %v976_v60, %v936_v36 }
 0x131   : > { %v742_v55 = vpop.f32.mrf.mxu0  ;;  %1266 = vmatprep.mubr.bf16.mxu1 %v2486_v0  ;;  %v965_v41 = vmul.bf16 1009007652, %v925_v32 }
 0x132   : > { %v986_v37 = vmul.bf16 1009007652, %v946_v19  ;;  %v1025_v31 = vmax.bf16 %v985_v2, %v945_v29  ;;  %v966_v8 = vmul.bf16 1009007652, %v926_v26  ;;  %v1554_v49 = vpop.permute.xlu1 %1553 }
 0x133   : > { %v744_v4 = vpop.f32.mrf.mxu0  ;;  %1308 = vmatpush1.bf16.msra.mxu0 %v1023_v54  ;;  %v1005_v45 = vmax.bf16 %v965_v41, %v925_v32  ;;  %v1586_v54 = vrot.slane %v1578_v6, %v2713_v48  ;;  %v1562_v61 = vrot.slane %v1554_v49, %v2713_v48 }
 0x134   : > { %v787_v12 = vpack.c.bf16 %v744_v4, %v740_v51  ;;  %1309 = vmatprep.subr.bf16.mxu0 %v1014_v56  ;;  %v1026_v40 = vmax.bf16 %v986_v37, %v946_v19  ;;  %v1006_v23 = vmax.bf16 %v966_v8, %v926_v26 }
 0x135   : > { %v746_v3 = vpop.f32.mrf.mxu0 }
 0x136   : > { %v955_v10 = vadd.bf16 %v2721_v57, %v787_v12  ;;  %v788_v13 = vpack.c.bf16 %v746_v3, %v742_v55  ;;  %2294 = vmatmul.mubr.msk.bf16.gmra.mxu0 %vm1065_vm2, %v2868_v52  ;;  %v1530_v34 = vpop.permute.xlu1 %1529 }
 0x137   : > { %2296 = vmatmul.mubr.msk.bf16.gmra.mxu1 %vm1065_vm2, %v2816_v59  ;;  %1310 = vmatpush1.bf16.msra.mxu0 %v1013_v58  ;;  %v1538_v15 = vrot.slane %v1530_v34, %v2713_v48 }
 0x138   : > { %v956_v20 = vadd.bf16 %v2721_v57, %v788_v13  ;;  %1311 = vmatprep.subr.bf16.mxu0 %v1004_v14  ;;  %1276 = vmatprep.mubr.bf16.mxu1 %v2486_v0  ;;  %v995_v63 = vmul.bf16 1009007652, %v955_v10 }
 0x139   : > { %1329 = vmatprep.mubr.bf16.mxu0 %v2486_v0 }
 0x13a   : > { %v996_v22 = vmul.bf16 1009007652, %v956_v20  ;;  %v1035_v18 = vmax.bf16 %v995_v63, %v955_v10  ;;  %v1506_v19 = vpop.permute.xlu1 %1505 }
 0x13b   : > { %1312 = vmatpush1.bf16.msra.mxu0 %v1003_v24  ;;  %v1514_v2 = vrot.slane %v1506_v19, %v2713_v48 }
 0x13c   : > { %v1036_v57 = vmax.bf16 %v996_v22, %v956_v20 }
 0x13e   : > { %2299 = vmatmul.mubr.msk.bf16.vlgmr.msra.gmra.mxu0 %vm1065_vm2, %v2787_v30  ;;  %1378 = vmatprep.subr.bf16.mxu1 %v1036_v57 }
 0x13f   : > { %2297 = vmatmul.mubr.msk.bf16.gmra.mxu1 %vm1065_vm2, %v2835_v27  ;;  %1339 = vmatprep.mubr.bf16.mxu0 %v2486_v0 }
 0x140   : > { %1379 = vmatpush1.bf16.msra.mxu1 %v1035_v18  ;;  %1286 = vmatprep.mubr.bf16.mxu1 %v2486_v0 }
 0x141   : > { %1380 = vmatprep.subr.bf16.mxu1 %v1026_v40 }
 0x144   : > { %1381 = vmatpush1.bf16.msra.mxu1 %v1025_v31 }
 0x145   : > { %1382 = vmatprep.subr.bf16.mxu1 %v1016_v7 }
 0x146   : > { %2300 = vmatmul.mubr.msk.bf16.gmra.mxu0 %vm1065_vm2, %v2816_v59 }
 0x147   : > { %2298 = vmatmul.mubr.msk.bf16.gmra.mxu1 %vm1065_vm2, %v2868_v52  ;;  %1349 = vmatprep.mubr.bf16.mxu0 %v2486_v0 }
 0x148   : > { %1383 = vmatpush1.bf16.msra.mxu1 %v1015_v11  ;;  %1402 = vmatprep.mubr.bf16.mxu1 %v2486_v0 }
 0x149   : > { %1384 = vmatprep.subr.bf16.mxu1 %v1006_v23 }
 0x14c   : > { %1385 = vmatpush1.bf16.msra.mxu1 %v1005_v45 }
 0x14e   : > { %2301 = vmatmul.mubr.msk.bf16.gmra.mxu0 %vm1065_vm2, %v2835_v27 }
 0x14f   : > { %2303 = vmatmul.mubr.msk.bf16.vlgmr.msra.gmra.mxu1 %vm1065_vm2, %v2787_v30  ;;  %1359 = vmatprep.mubr.bf16.mxu0 %v2486_v0 }
 0x150   : > { %1412 = vmatprep.mubr.bf16.mxu1 %v2486_v0 }
 0x156   : > { %2302 = vmatmul.mubr.msk.bf16.gmra.mxu0 %vm1065_vm2, %v2868_v52 }
 0x157   : > { %2304 = vmatmul.mubr.msk.bf16.gmra.mxu1 %vm1065_vm2, %v2816_v59  ;;  %1773 = vmatprep.mubr.bf16.mxu0 %v2486_v0 }
 0x158   : > { %1422 = vmatprep.mubr.bf16.mxu1 %v2486_v0 }
 0x15f   : > { %2305 = vmatmul.mubr.msk.bf16.gmra.mxu1 %vm1065_vm2, %v2835_v27  ;;  %v1566_v27 = vpop.permute.xlu0 %1565 }
 0x160   : > { %1432 = vmatprep.mubr.bf16.mxu1 %v2486_v0  ;;  %v1574_v47 = vrot.slane %v1566_v27, %v2713_v48 }
 0x162   : > { %v2985_v3 = vcombine.low %v1574_v47, %v1586_v54 }
 0x167   : > { %2306 = vmatmul.mubr.msk.bf16.gmra.mxu1 %vm1065_vm2, %v2868_v52  ;;  %v1542_v52 = vpop.permute.xlu0 %1541 }
 0x168   : > { %1814 = vmatprep.mubr.bf16.mxu1 %v2486_v0  ;;  %v1550_v56 = vrot.slane %v1542_v52, %v2713_v48 }
 0x16a   : > { %v2989_v13 = vcombine.low %v1550_v56, %v1562_v61 }
 0x16b   : > { %v1518_v4 = vpop.permute.xlu0 %1517 }
 0x16c   : > { %v1526_v14 = vrot.slane %v1518_v4, %v2713_v48 }
 0x16e   : > { %v2999_v35 = vcombine.low %v1526_v14, %v1538_v15 }
 0x16f   : > { %v1494_v37 = vpop.permute.xlu0 %1493 }
 0x170   : > { %v1502_v38 = vrot.slane %v1494_v37, %v2713_v48 }
 0x172   : > { %v3010_v11 = vcombine.low %v1502_v38, %v1514_v2  ;;  %v3042_v38 = vld [vmem:[%s3254_s5] sm:$0x3] }
 0x1ca   : > { %v2965_v30 = vpop.f32.mrf.mxu1 }
 0x1cc   : > { %v2967_v42 = vpop.f32.mrf.mxu1 }
 0x1ce   : > { %v2969_v43 = vpop.f32.mrf.mxu1 }
 0x1cf   : > { %v1443_v45 = vpack.c.bf16 %v2969_v43, %v2965_v30 }
 0x1d0   : > { %v2971_v59 = vpop.f32.mrf.mxu1 }
 0x1d1   : > { %v1444_v25 = vpack.c.bf16 %v2971_v59, %v2967_v42 }
 0x1d2   : > { %v1122_v46 = vpop.f32.mrf.mxu1 }
 0x1d3   : > { %v1612_v42 = vadd.bf16 %v3010_v11, %v1444_v25 }
 0x1d4   : > { %v1124_v21 = vpop.f32.mrf.mxu1 }
 0x1d6   : > { %v1126_v16 = vpop.f32.mrf.mxu1 }
 0x1d7   : > { %v1453_v26 = vpack.c.bf16 %v1126_v16, %v1122_v46 }
 0x1d8   : > { %v1128_v62 = vpop.f32.mrf.mxu1 }
 0x1d9   : > { %v1454_v63 = vpack.c.bf16 %v1128_v62, %v1124_v21  ;;  %v1621_v46 = vadd.bf16 %v2999_v35, %v1453_v26 }
 0x1da   : > { %v1132_v9 = vpop.f32.mrf.mxu1 }
 0x1db   : > { %v1622_v31 = vadd.bf16 %v2999_v35, %v1454_v63  ;;  %v1661_v30 = vmul.bf16 1009007652, %v1621_v46 }
 0x1dc   : > { %v1134_v50 = vpop.f32.mrf.mxu1 }
 0x1dd   : > { %v1662_v59 = vmul.bf16 1009007652, %v1622_v31  ;;  %v1701_v56 = vmax.bf16 %v1661_v30, %v1621_v46 }
 0x1de   : > { %v1136_v17 = vpop.f32.mrf.mxu1  ;;  %v2973_v53 = vpop.f32.mrf.mxu0 }
 0x1df   : > { %v1463_v24 = vpack.c.bf16 %v1136_v17, %v1132_v9  ;;  %v1652_v17 = vmul.bf16 1009007652, %v1612_v42  ;;  %v1702_v34 = vmax.bf16 %v1662_v59, %v1622_v31 }
 0x1e0   : > { %v1138_v39 = vpop.f32.mrf.mxu1  ;;  %v2975_v51 = vpop.f32.mrf.mxu0 }
 0x1e1   : > { %v1464_v58 = vpack.c.bf16 %v1138_v39, %v1134_v50  ;;  %v1631_v60 = vadd.bf16 %v2989_v13, %v1463_v24  ;;  %v1611_v50 = vadd.bf16 %v3010_v11, %v1443_v45 }
 0x1e2   : > { %v1142_v55 = vpop.f32.mrf.mxu1  ;;  %v2979_v44 = vpop.f32.mrf.mxu0 }
 0x1e3   : > { %v1632_v22 = vadd.bf16 %v2989_v13, %v1464_v58  ;;  %v1671_v21 = vmul.bf16 1009007652, %v1631_v60  ;;  %v1692_v58 = vmax.bf16 %v1652_v17, %v1612_v42 }
 0x1e4   : > { %v1144_v12 = vpop.f32.mrf.mxu1  ;;  %v2983_v1 = vpop.f32.mrf.mxu0 }
 0x1e5   : > { %v1672_v8 = vmul.bf16 1009007652, %v1632_v22  ;;  %v1711_v43 = vmax.bf16 %v1671_v21, %v1631_v60 }
 0x1e6   : > { %v1146_v5 = vpop.f32.mrf.mxu1  ;;  %v2987_v10 = vpop.f32.mrf.mxu0 }
 0x1e7   : > { %v1473_v20 = vpack.c.bf16 %v1146_v5, %v1142_v55  ;;  %v1712_v62 = vmax.bf16 %v1672_v8, %v1632_v22  ;;  %v1651_v55 = vmul.bf16 1009007652, %v1611_v50 }
 0x1e8   : > { %v1148_v28 = vpop.f32.mrf.mxu1  ;;  %v2993_v29 = vpop.f32.mrf.mxu0 }
 0x1e9   : > { %v1641_v33 = vadd.bf16 %v2985_v3, %v1473_v20  ;;  %v1474_v36 = vpack.c.bf16 %v1148_v28, %v1144_v12  ;;  %v1691_v19 = vmax.bf16 %v1651_v55, %v1611_v50 }
 0x1ea   : > { %v2997_v57 = vpop.f32.mrf.mxu0 }
 0x1eb   : > { %v1642_v18 = vadd.bf16 %v2985_v3, %v1474_v36  ;;  %v1681_v40 = vmul.bf16 1009007652, %v1641_v33 }
 0x1ec   : > { %v3005_v32 = vpop.f32.mrf.mxu0 }
 0x1ed   : > { %v1682_v7 = vmul.bf16 1009007652, %v1642_v18  ;;  %v1721_v6 = vmax.bf16 %v1681_v40, %v1641_v33  ;;  %v1456_v28 = vpack.c.bf16 %v3005_v32, %v2993_v29  ;;  %v1455_v29 = vpack.c.bf16 %v2997_v57, %v2987_v10 }
 0x1ee   : > { %v1205_v41 = vpop.f32.mrf.mxu0  ;;  %v1446_v32 = vpack.c.bf16 %v2983_v1, %v2975_v51 }
 0x1ef   : > { %v3012_v23 = vpop.f32.mrf.mxu1  ;;  %v1722_v48 = vmax.bf16 %v1682_v7, %v1642_v18  ;;  %v1624_v25 = vadd.bf16 %v2999_v35, %v1456_v28  ;;  %v1623_v45 = vadd.bf16 %v2999_v35, %v1455_v29 }
 0x1f0   : > { %v1207_v16 = vpop.f32.mrf.mxu0  ;;  %v1614_v21 = vadd.bf16 %v3010_v11, %v1446_v32 }
 0x1f1   : > { %v3018_v27 = vpop.f32.mrf.mxu1  ;;  %1749 = vmatprep.subr.bf16.mxu0 %v1722_v48  ;;  %v1445_v48 = vpack.c.bf16 %v2979_v44, %v2973_v53  ;;  %v1663_v53 = vmul.bf16 1009007652, %v1623_v45 }
 0x1f2   : > { %v1209_v9 = vpop.f32.mrf.mxu0  ;;  %1750 = vmatpush1.bf16.msra.mxu0 %v1721_v6  ;;  %v1664_v6 = vmul.bf16 1009007652, %v1624_v25  ;;  %v1654_v30 = vmul.bf16 1009007652, %v1614_v21 }
 0x1f3   : > { %v3020_v49 = vpop.f32.mrf.mxu1  ;;  %1751 = vmatprep.subr.bf16.mxu0 %v1712_v62  ;;  %v1465_v20 = vpack.c.bf16 %v1209_v9, %v1205_v41  ;;  %v1613_v9 = vadd.bf16 %v3010_v11, %v1445_v48 }
 0x1f4   : > { %v1211_v52 = vpop.f32.mrf.mxu0 }
 0x1f5   : > { %v3023_v39 = vpop.f32.mrf.mxu1  ;;  %v1466_v4 = vpack.c.bf16 %v1211_v52, %v1207_v16  ;;  %v1633_v26 = vadd.bf16 %v2989_v13, %v1465_v20  ;;  %v1704_v52 = vmax.bf16 %v1664_v6, %v1624_v25  ;;  %v1653_v55 = vmul.bf16 1009007652, %v1613_v9 }
 0x1f6   : > { %v1215_v47 = vpop.f32.mrf.mxu0  ;;  %1752 = vmatpush1.bf16.msra.mxu0 %v1711_v43 }
 0x1f7   : > { %v3025_v54 = vpop.f32.mrf.mxu1  ;;  %1753 = vmatprep.subr.bf16.mxu0 %v1702_v34  ;;  %v1634_v63 = vadd.bf16 %v2989_v13, %v1466_v4  ;;  %v1673_v51 = vmul.bf16 1009007652, %v1633_v26 }
 0x1f8   : > { %v1217_v61 = vpop.f32.mrf.mxu0 }
 0x1f9   : > { %v3027_v12 = vpop.f32.mrf.mxu1  ;;  %v1674_v31 = vmul.bf16 1009007652, %v1634_v63  ;;  %v1713_v44 = vmax.bf16 %v1673_v51, %v1633_v26 }
 0x1fa   : > { %v1219_v5 = vpop.f32.mrf.mxu0  ;;  %1754 = vmatpush1.bf16.msra.mxu0 %v1701_v56  ;;  %v1703_v56 = vmax.bf16 %v1663_v53, %v1623_v45 }
 0x1fb   : > { %v1475_v14 = vpack.c.bf16 %v1219_v5, %v1215_v47  ;;  %v3029_v15 = vpop.f32.mrf.mxu1  ;;  %1755 = vmatprep.subr.bf16.mxu0 %v1692_v58  ;;  %v1714_v42 = vmax.bf16 %v1674_v31, %v1634_v63 }
 0x1fc   : > { %v1221_v24 = vpop.f32.mrf.mxu0 }
 0x1fd   : > { %v1643_v22 = vadd.bf16 %v2985_v3, %v1475_v14  ;;  %v1476_v33 = vpack.c.bf16 %v1221_v24, %v1217_v61  ;;  %v3035_v36 = vpop.f32.mrf.mxu1  ;;  %v1694_v14 = vmax.bf16 %v1654_v30, %v1614_v21 }
 0x1fe   : > { %v3037_v37 = vpop.f32.mrf.mxu0  ;;  %1756 = vmatpush1.bf16.msra.mxu0 %v1691_v19  ;;  %v1458_v19 = vpack.c.bf16 %v3035_v36, %v3027_v12 }
 0x1ff   : > { %v1644_v2 = vadd.bf16 %v2985_v3, %v1476_v33  ;;  %v1278_v18 = vpop.f32.mrf.mxu1  ;;  %v1683_v60 = vmul.bf16 1009007652, %v1643_v22  ;;  %v1693_v33 = vmax.bf16 %v1653_v55, %v1613_v9 }
 0x200   : > { %v3048_v40 = vpop.f32.mrf.mxu0  ;;  %v1626_v32 = vadd.bf16 %v2999_v35, %v1458_v19 }
 0x201   : > { %v1684_v8 = vmul.bf16 1009007652, %v1644_v2  ;;  %v1280_v7 = vpop.f32.mrf.mxu1  ;;  %2311 = vmatmul.mubr.msk.bf16.vlgmr.msra.gmra.mxu0 %vm1065_vm2, %v3042_v38  ;;  %v1723_v1 = vmax.bf16 %v1683_v60, %v1643_v22  ;;  %v1448_v60 = vpack.c.bf16 %v3023_v39, %v3018_v27 }
 0x202   : > { %v3055_v41 = vpop.f32.mrf.mxu0  ;;  %1855 = vmatprep.mubr.bf16.mxu0 %v2486_v0  ;;  %v1666_v39 = vmul.bf16 1009007652, %v1626_v32 }
 0x203   : > { %v1282_v10 = vpop.f32.mrf.mxu1  ;;  %v1724_v57 = vmax.bf16 %v1684_v8, %v1644_v2  ;;  %v1457_v2 = vpack.c.bf16 %v3029_v15, %v3025_v54  ;;  %v1447_v54 = vpack.c.bf16 %v3020_v49, %v3012_v23  ;;  %v1616_v27 = vadd.bf16 %v3010_v11, %v1448_v60 }
 0x204   : > { %v3061_v46 = vpop.f32.mrf.mxu0  ;;  %v1467_v58 = vpack.c.bf16 %v1282_v10, %v1278_v18  ;;  %v1706_v30 = vmax.bf16 %v1666_v39, %v1626_v32 }
 0x205   : > { %v1284_v16 = vpop.f32.mrf.mxu1  ;;  %1790 = vmatprep.subr.bf16.mxu1 %v1724_v57  ;;  %v1625_v15 = vadd.bf16 %v2999_v35, %v1457_v2  ;;  %v1615_v49 = vadd.bf16 %v3010_v11, %v1447_v54  ;;  %v1656_v53 = vmul.bf16 1009007652, %v1616_v27 }
 0x206   : > { %v3064_v59 = vpop.f32.mrf.mxu0  ;;  %1791 = vmatpush1.bf16.msra.mxu1 %v1723_v1  ;;  %v1468_v17 = vpack.c.bf16 %v1284_v16, %v1280_v7  ;;  %v1635_v12 = vadd.bf16 %v2989_v13, %v1467_v58 }
 0x207   : > { %v1288_v62 = vpop.f32.mrf.mxu1  ;;  %1792 = vmatprep.subr.bf16.mxu1 %v1714_v42  ;;  %v1665_v6 = vmul.bf16 1009007652, %v1625_v15 }
 0x208   : > { %v3067_v50 = vpop.f32.mrf.mxu0  ;;  %v1636_v20 = vadd.bf16 %v2989_v13, %v1468_v17  ;;  %v1675_v48 = vmul.bf16 1009007652, %v1635_v12  ;;  %v1655_v17 = vmul.bf16 1009007652, %v1615_v49 }
 0x209   : > { %v1290_v43 = vpop.f32.mrf.mxu1 }
 0x20a   : > { %v3069_v34 = vpop.f32.mrf.mxu0  ;;  %1793 = vmatpush1.bf16.msra.mxu1 %v1713_v44  ;;  %v1676_v25 = vmul.bf16 1009007652, %v1636_v20  ;;  %v1715_v42 = vmax.bf16 %v1675_v48, %v1635_v12 }
 0x20b   : > { %v1292_v47 = vpop.f32.mrf.mxu1  ;;  %1794 = vmatprep.subr.bf16.mxu1 %v1704_v52 }
 0x20c   : > { %v1477_v61 = vpack.c.bf16 %v1292_v47, %v1288_v62  ;;  %v3071_v4 = vpop.f32.mrf.mxu0  ;;  %v1716_v21 = vmax.bf16 %v1676_v25, %v1636_v20  ;;  %v1705_v47 = vmax.bf16 %v1665_v6, %v1625_v15  ;;  %v1696_v20 = vmax.bf16 %v1656_v53, %v1616_v27 }
 0x20d   : > { %v1294_v5 = vpop.f32.mrf.mxu1  ;;  %v1449_v25 = vpack.c.bf16 %v3055_v41, %v3037_v37 }
 0x20e   : > { %v1645_v24 = vadd.bf16 %v2985_v3, %v1477_v61  ;;  %v1478_v28 = vpack.c.bf16 %v1294_v5, %v1290_v43  ;;  %v3077_v63 = vpop.f32.mrf.mxu0  ;;  %1795 = vmatpush1.bf16.msra.mxu1 %v1703_v56  ;;  %v1460_v61 = vpack.c.bf16 %v3071_v4, %v3067_v50  ;;  %v1450_v50 = vpack.c.bf16 %v3061_v46, %v3048_v40 }
 0x20f   : > { %v3079_v22 = vpop.f32.mrf.mxu1  ;;  %1796 = vmatprep.subr.bf16.mxu1 %v1694_v14  ;;  %v1617_v37 = vadd.bf16 %v3010_v11, %v1449_v25 }
 0x210   : > { %v1646_v18 = vadd.bf16 %v2985_v3, %v1478_v28  ;;  %v1353_v29 = vpop.f32.mrf.mxu0  ;;  %v1685_v36 = vmul.bf16 1009007652, %v1645_v24  ;;  %v1628_v4 = vadd.bf16 %v2999_v35, %v1460_v61 }
 0x211   : > { %v3085_v26 = vpop.f32.mrf.mxu1 }
 0x212   : > { %v1686_v31 = vmul.bf16 1009007652, %v1646_v18  ;;  %v1355_v8 = vpop.f32.mrf.mxu0  ;;  %1797 = vmatpush1.bf16.msra.mxu1 %v1693_v33  ;;  %v1725_v45 = vmax.bf16 %v1685_v36, %v1645_v24  ;;  %v1695_v33 = vmax.bf16 %v1655_v17, %v1615_v49  ;;  %v1668_v54 = vmul.bf16 1009007652, %v1628_v4 }
 0x213   : > { %v3090_v7 = vpop.f32.mrf.mxu1  ;;  %v1469_v55 = vpack.c.bf16 %v1355_v8, %v3077_v63  ;;  %v1459_v63 = vpack.c.bf16 %v3069_v34, %v3064_v59  ;;  %v1618_v8 = vadd.bf16 %v3010_v11, %v1450_v50 }
 0x214   : > { %v1357_v10 = vpop.f32.mrf.mxu0  ;;  %v1726_v57 = vmax.bf16 %v1686_v31, %v1646_v18 }
 0x215   : > { %v3095_v51 = vpop.f32.mrf.mxu1  ;;  %2312 = vmatmul.mubr.msk.bf16.vlgmr.msra.gmra.mxu1 %vm1065_vm2, %v3042_v38  ;;  %v1470_v62 = vpack.c.bf16 %v1357_v10, %v1353_v29  ;;  %v1637_v2 = vadd.bf16 %v2989_v13, %v1469_v55  ;;  %v1627_v59 = vadd.bf16 %v2999_v35, %v1459_v63 }
 0x216   : > { %1831 = vmatprep.subr.bf16.mxu0 %v1726_v57  ;;  %v1361_v1 = vpop.f32.mrf.mxu0  ;;  %1896 = vmatprep.mubr.bf16.mxu1 %v2486_v0  ;;  %v1658_v57 = vmul.bf16 1009007652, %v1618_v8 }
 0x217   : > { %v3101_v23 = vpop.f32.mrf.mxu1  ;;  %1832 = vmatpush1.bf16.msra.mxu0 %v1725_v45  ;;  %v1638_v58 = vadd.bf16 %v2989_v13, %v1470_v62  ;;  %v1677_v34 = vmul.bf16 1009007652, %v1637_v2  ;;  %v1667_v41 = vmul.bf16 1009007652, %v1627_v59  ;;  %v1708_v45 = vmax.bf16 %v1668_v54, %v1628_v4 }
 0x218   : > { %1833 = vmatprep.subr.bf16.mxu0 %v1716_v21  ;;  %v1363_v16 = vpop.f32.mrf.mxu0 }
 0x219   : > { %v3104_v9 = vpop.f32.mrf.mxu1  ;;  %v1678_v29 = vmul.bf16 1009007652, %v1638_v58  ;;  %v1717_v10 = vmax.bf16 %v1677_v34, %v1637_v2  ;;  %v1707_v21 = vmax.bf16 %v1667_v41, %v1627_v59  ;;  %v3147_v2 = vpop.permute.xlu0 %1735 }
 0x21a   : > { %v1365_v44 = vpop.f32.mrf.mxu0 }
 0x21b   : > { %v1479_v43 = vpack.c.bf16 %v1365_v44, %v1361_v1  ;;  %v3106_v52 = vpop.f32.mrf.mxu1  ;;  %1834 = vmatpush1.bf16.msra.mxu0 %v1715_v42  ;;  %v1718_v40 = vmax.bf16 %v1678_v29, %v1638_v58  ;;  %v1657_v1 = vmul.bf16 1009007652, %v1617_v37  ;;  %v1698_v42 = vmax.bf16 %v1658_v57, %v1618_v8 }
 0x21c   : > { %1835 = vmatprep.subr.bf16.mxu0 %v1706_v30  ;;  %v1367_v56 = vpop.f32.mrf.mxu0  ;;  %v1461_v17 = vpack.c.bf16 %v3106_v52, %v3101_v23 }
 0x21d   : > { %v1647_v5 = vadd.bf16 %v2985_v3, %v1479_v43  ;;  %v1480_v14 = vpack.c.bf16 %v1367_v56, %v1363_v16  ;;  %v1420_v19 = vpop.f32.mrf.mxu1  ;;  %v1697_v30 = vmax.bf16 %v1657_v1, %v1617_v37  ;;  %v1452_v56 = vpack.c.bf16 %v3095_v51, %v3085_v26 }
 0x21e   : > { %v1462_v62 = vpack.c.bf16 %v1420_v19, %v3104_v9 }
 0x21f   : > { %v1648_v24 = vadd.bf16 %v2985_v3, %v1480_v14  ;;  %v1424_v28 = vpop.f32.mrf.mxu1  ;;  %1836 = vmatpush1.bf16.msra.mxu0 %v1705_v47  ;;  %v1687_v18 = vmul.bf16 1009007652, %v1647_v5  ;;  %v1451_v14 = vpack.c.bf16 %v3090_v7, %v3079_v22 }
 0x220   : > { %1837 = vmatprep.subr.bf16.mxu0 %v1696_v20  ;;  %v1630_v9 = vadd.bf16 %v2999_v35, %v1462_v62 }
 0x221   : > { %v1688_v12 = vmul.bf16 1009007652, %v1648_v24  ;;  %v1426_v36 = vpop.f32.mrf.mxu1  ;;  %v1727_v31 = vmax.bf16 %v1687_v18, %v1647_v5  ;;  %v1619_v51 = vadd.bf16 %v3010_v11, %v1451_v14 }
 0x222   : > { %v1670_v23 = vmul.bf16 1009007652, %v1630_v9 }
 0x223   : > { %v1428_v60 = vpop.f32.mrf.mxu1  ;;  %1838 = vmatpush1.bf16.msra.mxu0 %v1695_v33  ;;  %v1728_v32 = vmax.bf16 %v1688_v12, %v1648_v24 }
 0x224   : > { %v1471_v6 = vpack.c.bf16 %v1428_v60, %v1424_v28  ;;  %v1710_v22 = vmax.bf16 %v1670_v23, %v1630_v9 }
 0x225   : > { %v1430_v15 = vpop.f32.mrf.mxu1  ;;  %1872 = vmatprep.subr.bf16.mxu1 %v1728_v32 }
 0x226   : > { %2313 = vmatmul.mubr.msk.bf16.vlgmr.msra.gmra.mxu0 %vm1065_vm2, %v3042_v38  ;;  %1873 = vmatpush1.bf16.msra.mxu1 %v1727_v31  ;;  %v1472_v27 = vpack.c.bf16 %v1430_v15, %v1426_v36  ;;  %v1639_v47 = vadd.bf16 %v2989_v13, %v1471_v6 }
 0x227   : > { %v1434_v46 = vpop.f32.mrf.mxu1  ;;  %1874 = vmatprep.subr.bf16.mxu1 %v1718_v40  ;;  %1937 = vmatprep.mubr.bf16.mxu0 %v2486_v0 }
 0x228   : > { %v1640_v0 = vadd.bf16 %v2989_v13, %v1472_v27  ;;  %v1679_v19 = vmul.bf16 1009007652, %v1639_v47  ;;  %v1620_v13 = vadd.bf16 %v3010_v11, %v1452_v56 }
 0x229   : > { %v1436_v48 = vpop.f32.mrf.mxu1 }
 0x22a   : > { %1875 = vmatpush1.bf16.msra.mxu1 %v1717_v10  ;;  %v1680_v61 = vmul.bf16 1009007652, %v1640_v0  ;;  %v1719_v24 = vmax.bf16 %v1679_v19, %v1639_v47  ;;  %v1660_v28 = vmul.bf16 1009007652, %v1620_v13 }
 0x22b   : > { %v1438_v39 = vpop.f32.mrf.mxu1  ;;  %1876 = vmatprep.subr.bf16.mxu1 %v1708_v45 }
 0x22c   : > { %v1481_v49 = vpack.c.bf16 %v1438_v39, %v1434_v46  ;;  %v1720_v26 = vmax.bf16 %v1680_v61, %v1640_v0  ;;  %v1700_v33 = vmax.bf16 %v1660_v28, %v1620_v13 }
 0x22d   : > { %v1440_v16 = vpop.f32.mrf.mxu1 }
 0x22e   : > { %v1649_v53 = vadd.bf16 %v2985_v3, %v1481_v49  ;;  %v1482_v44 = vpack.c.bf16 %v1440_v16, %v1436_v48  ;;  %1877 = vmatpush1.bf16.msra.mxu1 %v1707_v21 }
 0x22f   : > { %1878 = vmatprep.subr.bf16.mxu1 %v1698_v42 }
 0x230   : > { %v1650_v43 = vadd.bf16 %v2985_v3, %v1482_v44  ;;  %v1689_v55 = vmul.bf16 1009007652, %v1649_v53  ;;  %v1629_v3 = vadd.bf16 %v2999_v35, %v1461_v17  ;;  %v1659_v35 = vmul.bf16 1009007652, %v1619_v51 }
 0x232   : > { %v1690_v58 = vmul.bf16 1009007652, %v1650_v43  ;;  %1879 = vmatpush1.bf16.msra.mxu1 %v1697_v30  ;;  %v1729_v20 = vmax.bf16 %v1689_v55, %v1649_v53  ;;  %v1669_v52 = vmul.bf16 1009007652, %v1629_v3  ;;  %v1699_v63 = vmax.bf16 %v1659_v35, %v1619_v51 }
 0x234   : > { %v1730_v5 = vmax.bf16 %v1690_v58, %v1650_v43  ;;  %v1709_v7 = vmax.bf16 %v1669_v52, %v1629_v3 }
 0x235   : > { %2314 = vmatmul.mubr.msk.bf16.vlgmr.msra.gmra.mxu1 %vm1065_vm2, %v3042_v38 }
 0x236   : > { %1913 = vmatprep.subr.bf16.mxu0 %v1730_v5 }
 0x237   : > { %1914 = vmatpush1.bf16.msra.mxu0 %v1729_v20 }
 0x238   : > { %1915 = vmatprep.subr.bf16.mxu0 %v1720_v26 }
 0x23b   : > { %1916 = vmatpush1.bf16.msra.mxu0 %v1719_v24 }
 0x23c   : > { %1917 = vmatprep.subr.bf16.mxu0 %v1710_v22 }
 0x23f   : > { %1918 = vmatpush1.bf16.msra.mxu0 %v1709_v7 }
 0x240   : > { %1919 = vmatprep.subr.bf16.mxu0 %v1700_v33 }
 0x243   : > { %1920 = vmatpush1.bf16.msra.mxu0 %v1699_v63 }
 0x246   : > { %2315 = vmatmul.mubr.msk.bf16.vlgmr.msra.gmra.mxu0 %vm1065_vm2, %v3042_v38 }
 0x2c1   : > { %v1775_v18 = vpop.f32.mrf.mxu0 }
 0x2c2   : > { %v1776_v11 = vadd.f32 %v1775_v18, %v3147_v2 }
 0x2c3   : > { %v1777_v50 = vpop.f32.mrf.mxu0 }
 0x2c4   : > { %v1946_v4 = vsel %vm353_vm0, %v1776_v11, -inf  ;;  %v1778_v29 = vadd.f32 %v1777_v50, %v3147_v2 }
 0x2c5   : > { %v1947_v12 = vrot.slane %v1946_v4, 4  ;;  %v1779_v36 = vpop.f32.mrf.mxu0 }
 0x2c6   : > { %v1953_v60 = vsel %vm353_vm0, %v1778_v29, -inf }
 0x2c7   : > { %v1948_v32 = vmax.f32 %v1946_v4, %v1947_v12  ;;  %v1954_v25 = vrot.slane %v1953_v60, 4  ;;  %v1780_v59 = vpop.f32.mrf.mxu0 }
 0x2c9   : > { %v1949_v34 = vrot.slane %v1948_v32, 2  ;;  %v1955_v31 = vmax.f32 %v1953_v60, %v1954_v25 }
 0x2cb   : > { %v1950_v38 = vmax.f32 %v1948_v32, %v1949_v34  ;;  %v1956_v8 = vrot.slane %v1955_v31, 2 }
 0x2cd   : > { %v1951_v54 = vrot.slane %v1950_v38, 1  ;;  %v1957_v15 = vmax.f32 %v1955_v31, %v1956_v8 }
 0x2cf   : > { %v1952_v40 = vmax.f32 %v1950_v38, %v1951_v54  ;;  %v1958_v46 = vrot.slane %v1957_v15, 1 }
 0x2d1   : > { %v2016_v37 = vsub.f32 %v1776_v11, %v1952_v40  ;;  %v1959_v41 = vmax.f32 %v1957_v15, %v1958_v46 }
 0x2d3   : > { %v2026_v10 = vmul.f32 1.442695, %v2016_v37  ;;  %v2017_v57 = vsub.f32 %v1778_v29, %v1959_v41 }
 0x2d5   : > { %2384 = vpow2.f32 %v2026_v10  ;;  %v2028_v48 = vmul.f32 1.442695, %v2017_v57  ;;  %v1816_v45 = vpop.f32.mrf.mxu1 }
 0x2d6   : > { %v1817_v27 = vadd.f32 %v1816_v45, %v3147_v2 }
 0x2d7   : > { %2386 = vpow2.f32 %v2028_v48  ;;  %v1818_v39 = vpop.f32.mrf.mxu1 }
 0x2d8   : > { %v1960_v1 = vsel %vm353_vm0, %v1817_v27, -inf  ;;  %v1819_v21 = vadd.f32 %v1818_v39, %v3147_v2 }
 0x2d9   : > { %v1961_v49 = vrot.slane %v1960_v1, 4  ;;  %v1820_v6 = vpop.f32.mrf.mxu1 }
 0x2da   : > { %v1967_v16 = vsel %vm353_vm0, %v1819_v21, -inf }
 0x2db   : > { %v1962_v42 = vmax.f32 %v1960_v1, %v1961_v49  ;;  %v1968_v62 = vrot.slane %v1967_v16, 4  ;;  %v1821_v0 = vpop.f32.mrf.mxu1 }
 0x2dd   : > { %v1963_v53 = vrot.slane %v1962_v42, 2  ;;  %v1969_v44 = vmax.f32 %v1967_v16, %v1968_v62 }
 0x2df   : > { %v1964_v30 = vmax.f32 %v1962_v42, %v1963_v53  ;;  %v1970_v43 = vrot.slane %v1969_v44, 2 }
 0x2e1   : > { %v1965_v17 = vrot.slane %v1964_v30, 1  ;;  %v1971_v47 = vmax.f32 %v1969_v44, %v1970_v43 }
 0x2e2   : > { %v3157_v55 = vpop.eup %2384 }
 0x2e3   : > { %v2046_v56 = vsel %vm353_vm0, %v3157_v55, 0.0  ;;  %v1966_v9 = vmax.f32 %v1964_v30, %v1965_v17  ;;  %v1972_v61 = vrot.slane %v1971_v47, 1 }
 0x2e4   : > { %v3161_v58 = vpop.eup %2386  ;;  %v2047_v5 = vrot.slane %v2046_v56, 4 }
 0x2e5   : > { %v2053_v14 = vsel %vm353_vm0, %v3161_v58, 0.0  ;;  %v2018_v3 = vsub.f32 %v1817_v27, %v1966_v9  ;;  %v1973_v19 = vmax.f32 %v1971_v47, %v1972_v61 }
 0x2e6   : > { %v2048_v20 = vadd.f32 %v2047_v5, %v2046_v56  ;;  %v2054_v13 = vrot.slane %v2053_v14, 4  ;;  %v1857_v23 = vpop.f32.mrf.mxu0 }
 0x2e7   : > { %v2030_v26 = vmul.f32 1.442695, %v2018_v3  ;;  %v2019_v51 = vsub.f32 %v1819_v21, %v1973_v19  ;;  %v1858_v52 = vadd.f32 %v1857_v23, %v3147_v2 }
 0x2e8   : > { %v2049_v24 = vrot.slane %v2048_v20, 2  ;;  %v2055_v28 = vadd.f32 %v2054_v13, %v2053_v14  ;;  %v1859_v22 = vpop.f32.mrf.mxu0 }
 0x2e9   : > { %2388 = vpow2.f32 %v2030_v26  ;;  %v2032_v35 = vmul.f32 1.442695, %v2019_v51  ;;  %v1974_v7 = vsel %vm353_vm0, %v1858_v52, -inf  ;;  %v1860_v33 = vadd.f32 %v1859_v22, %v3147_v2 }
 0x2ea   : > { %v2050_v63 = vadd.f32 %v2049_v24, %v2048_v20  ;;  %v2056_v18 = vrot.slane %v2055_v28, 2  ;;  %v1975_v11 = vrot.slane %v1974_v7, 4  ;;  %v1861_v50 = vpop.f32.mrf.mxu0 }
 0x2eb   : > { %2390 = vpow2.f32 %v2032_v35  ;;  %v1981_v4 = vsel %vm353_vm0, %v1860_v33, -inf }
 0x2ec   : > { %v2051_v29 = vrot.slane %v2050_v63, 1  ;;  %v2057_v12 = vadd.f32 %v2056_v18, %v2055_v28  ;;  %v1976_v36 = vmax.f32 %v1974_v7, %v1975_v11  ;;  %v1982_v60 = vrot.slane %v1981_v4, 4  ;;  %v1862_v32 = vpop.f32.mrf.mxu0 }
 0x2ee   : > { %v2052_v25 = vadd.f32 %v2051_v29, %v2050_v63  ;;  %v2058_v59 = vrot.slane %v2057_v12, 1  ;;  %v1977_v34 = vrot.slane %v1976_v36, 2  ;;  %v1983_v31 = vmax.f32 %v1981_v4, %v1982_v60 }
 0x2f0   : > { %2392 = vrcp.f32 %v2052_v25  ;;  %v2059_v38 = vadd.f32 %v2058_v59, %v2057_v12  ;;  %v1978_v8 = vmax.f32 %v1976_v36, %v1977_v34  ;;  %v1984_v54 = vrot.slane %v1983_v31, 2 }
 0x2f2   : > { %2394 = vrcp.f32 %v2059_v38  ;;  %v1979_v15 = vrot.slane %v1978_v8, 1  ;;  %v1985_v40 = vmax.f32 %v1983_v31, %v1984_v54 }
 0x2f4   : > { %v1980_v46 = vmax.f32 %v1978_v8, %v1979_v15  ;;  %v1986_v37 = vrot.slane %v1985_v40, 1 }
 0x2f5   : > { %v1898_v41 = vpop.f32.mrf.mxu1 }
 0x2f6   : > { %v3169_v10 = vpop.eup %2388  ;;  %v2020_v57 = vsub.f32 %v1858_v52, %v1980_v46  ;;  %v1987_v48 = vmax.f32 %v1985_v40, %v1986_v37  ;;  %v1899_v45 = vadd.f32 %v1898_v41, %v3147_v2 }
 0x2f7   : > { %v2060_v27 = vsel %vm353_vm0, %v3169_v10, 0.0  ;;  %v1900_v39 = vpop.f32.mrf.mxu1 }
 0x2f8   : > { %v3174_v1 = vpop.eup %2390  ;;  %v2061_v21 = vrot.slane %v2060_v27, 4  ;;  %v2034_v49 = vmul.f32 1.442695, %v2020_v57  ;;  %v2021_v6 = vsub.f32 %v1860_v33, %v1987_v48  ;;  %v1988_v16 = vsel %vm353_vm0, %v1899_v45, -inf }
 0x2f9   : > { %v2067_v42 = vsel %vm353_vm0, %v3174_v1, 0.0  ;;  %v1989_v62 = vrot.slane %v1988_v16, 4  ;;  %v1901_v0 = vadd.f32 %v1900_v39, %v3147_v2  ;;  %v1902_v53 = vpop.f32.mrf.mxu1 }
 0x2fa   : > { %v2062_v44 = vadd.f32 %v2061_v21, %v2060_v27  ;;  %v2068_v30 = vrot.slane %v2067_v42, 4  ;;  %2396 = vpow2.f32 %v2034_v49  ;;  %v2036_v43 = vmul.f32 1.442695, %v2021_v6 }
 0x2fb   : > { %v1990_v17 = vmax.f32 %v1988_v16, %v1989_v62  ;;  %v1995_v47 = vsel %vm353_vm0, %v1901_v0, -inf  ;;  %v1903_v56 = vpop.f32.mrf.mxu1 }
 0x2fc   : > { %v2063_v9 = vrot.slane %v2062_v44, 2  ;;  %v2069_v61 = vadd.f32 %v2068_v30, %v2067_v42  ;;  %2398 = vpow2.f32 %v2036_v43  ;;  %v1996_v5 = vrot.slane %v1995_v47, 4 }
 0x2fd   : > { %v2393_v14 = vpop.eup %2392  ;;  %v1991_v3 = vrot.slane %v1990_v17, 2 }
 0x2fe   : > { %v2064_v19 = vadd.f32 %v2063_v9, %v2062_v44  ;;  %v2070_v20 = vrot.slane %v2069_v61, 2  ;;  %v1997_v13 = vmax.f32 %v1995_v47, %v1996_v5  ;;  %v2117_v26 = vmul.f32 %v2393_v14, %v3157_v55 }
 0x2ff   : > { %v2395_v23 = vpop.eup %2394  ;;  %v1992_v51 = vmax.f32 %v1990_v17, %v1991_v3 }
 0x300   : > { %v2119_v52 = vmul.f32 %v2395_v23, %v3161_v58  ;;  %v2065_v24 = vrot.slane %v2064_v19, 1  ;;  %v2071_v28 = vadd.f32 %v2070_v20, %v2069_v61  ;;  %v1998_v22 = vrot.slane %v1997_v13, 2 }
 0x301   : > { %v1993_v35 = vrot.slane %v1992_v51, 1 }
 0x302   : > { %v2066_v7 = vadd.f32 %v2065_v24, %v2064_v19  ;;  %v2072_v33 = vrot.slane %v2071_v28, 1  ;;  %v1999_v63 = vmax.f32 %v1997_v13, %v1998_v22  ;;  %v2146_v18 = vcombine.low %v2117_v26, %v2119_v52 }
 0x303   : > { %v1994_v11 = vmax.f32 %v1992_v51, %v1993_v35 }
 0x304   : > { %2400 = vrcp.f32 %v2066_v7  ;;  %v2073_v50 = vadd.f32 %v2072_v33, %v2071_v28  ;;  %v2000_v4 = vrot.slane %v1999_v63, 1  ;;  %2156 = vst [vmem:[%s3186_s16] sm:$0xff] %v2146_v18 }
 0x305   : > { %v2022_v55 = vsub.f32 %v1899_v45, %v1994_v11 }
 0x306   : > { %2402 = vrcp.f32 %v2073_v50  ;;  %v2001_v29 = vmax.f32 %v1999_v63, %v2000_v4  ;;  %v1939_v58 = vpop.f32.mrf.mxu0 }
 0x307   : > { %v3189_v12 = vpop.eup %2396  ;;  %v2038_v36 = vmul.f32 1.442695, %v2022_v55  ;;  %v1940_v60 = vadd.f32 %v1939_v58, %v3147_v2 }
 0x308   : > { %v2074_v32 = vsel %vm353_vm0, %v3189_v12, 0.0  ;;  %v2023_v25 = vsub.f32 %v1901_v0, %v2001_v29  ;;  %v1941_v59 = vpop.f32.mrf.mxu0 }
 0x309   : > { %v3194_v34 = vpop.eup %2398  ;;  %v2075_v31 = vrot.slane %v2074_v32, 4  ;;  %2404 = vpow2.f32 %v2038_v36  ;;  %v2002_v38 = vsel %vm353_vm0, %v1940_v60, -inf  ;;  %v1942_v8 = vadd.f32 %v1941_v59, %v3147_v2 }
 0x30a   : > { %v2081_v54 = vsel %vm353_vm0, %v3194_v34, 0.0  ;;  %v2040_v15 = vmul.f32 1.442695, %v2023_v25  ;;  %v2003_v40 = vrot.slane %v2002_v38, 4  ;;  %v1943_v46 = vpop.f32.mrf.mxu0 }
 0x30b   : > { %v2076_v37 = vadd.f32 %v2075_v31, %v2074_v32  ;;  %v2082_v41 = vrot.slane %v2081_v54, 4  ;;  %v2009_v57 = vsel %vm353_vm0, %v1942_v8, -inf }
 0x30c   : > { %2406 = vpow2.f32 %v2040_v15  ;;  %v2004_v48 = vmax.f32 %v2002_v38, %v2003_v40  ;;  %v2010_v45 = vrot.slane %v2009_v57, 4  ;;  %v1944_v27 = vpop.f32.mrf.mxu0 }
 0x30d   : > { %v2077_v39 = vrot.slane %v2076_v37, 2  ;;  %v2083_v21 = vadd.f32 %v2082_v41, %v2081_v54 }
 0x30e   : > { %v2005_v49 = vrot.slane %v2004_v48, 2  ;;  %v2011_v6 = vmax.f32 %v2009_v57, %v2010_v45 }
 0x30f   : > { %v2078_v16 = vadd.f32 %v2077_v39, %v2076_v37  ;;  %v2084_v2 = vrot.slane %v2083_v21, 2 }
 0x310   : > { %v2006_v42 = vmax.f32 %v2004_v48, %v2005_v49  ;;  %v2012_v62 = vrot.slane %v2011_v6, 2 }
 0x311   : > { %v2401_v0 = vpop.eup %2400  ;;  %v2079_v53 = vrot.slane %v2078_v16, 1  ;;  %v2085_v44 = vadd.f32 %v2084_v2, %v2083_v21 }
 0x312   : > { %v2007_v30 = vrot.slane %v2006_v42, 1  ;;  %v2013_v43 = vmax.f32 %v2011_v6, %v2012_v62  ;;  %v2121_v9 = vmul.f32 %v2401_v0, %v3169_v10 }
 0x313   : > { %v2403_v17 = vpop.eup %2402  ;;  %v2080_v47 = vadd.f32 %v2079_v53, %v2078_v16  ;;  %v2086_v56 = vrot.slane %v2085_v44, 1 }
 0x314   : > { %v2123_v61 = vmul.f32 %v2403_v17, %v3174_v1  ;;  %v2008_v5 = vmax.f32 %v2006_v42, %v2007_v30  ;;  %v2014_v14 = vrot.slane %v2013_v43, 1 }
 0x315   : > { %2408 = vrcp.f32 %v2080_v47  ;;  %v2087_v3 = vadd.f32 %v2086_v56, %v2085_v44 }
 0x316   : > { %v2405_v19 = vpop.eup %2404  ;;  %v2024_v20 = vsub.f32 %v1940_v60, %v2008_v5  ;;  %v2015_v13 = vmax.f32 %v2013_v43, %v2014_v14  ;;  %v2147_v23 = vcombine.low %v2121_v9, %v2123_v61 }
 0x317   : > { %2410 = vrcp.f32 %v2087_v3  ;;  %v2088_v26 = vsel %vm353_vm0, %v2405_v19, 0.0 }
 0x318   : > { %v2089_v51 = vrot.slane %v2088_v26, 4  ;;  %v2042_v52 = vmul.f32 1.442695, %v2024_v20  ;;  %v2025_v24 = vsub.f32 %v1942_v8, %v2015_v13  ;;  %2157 = vst [vmem:[%s3186_s16 + $0x8] sm:$0xff] %v2147_v23 }
 0x319   : > { %v2407_v28 = vpop.eup %2406 }
 0x31a   : > { %v2090_v22 = vadd.f32 %v2089_v51, %v2088_v26  ;;  %v2095_v10 = vsel %vm353_vm0, %v2407_v28, 0.0  ;;  %2412 = vpow2.f32 %v2042_v52  ;;  %v2044_v1 = vmul.f32 1.442695, %v2025_v24 }
 0x31b   : > { %v2096_v35 = vrot.slane %v2095_v10, 4 }
 0x31c   : > { %v2091_v7 = vrot.slane %v2090_v22, 2  ;;  %2414 = vpow2.f32 %v2044_v1 }
 0x31d   : > { %v2097_v33 = vadd.f32 %v2096_v35, %v2095_v10 }
 0x31e   : > { %v2092_v63 = vadd.f32 %v2091_v7, %v2090_v22 }
 0x31f   : > { %v2098_v18 = vrot.slane %v2097_v33, 2 }
 0x320   : > { %v2093_v11 = vrot.slane %v2092_v63, 1 }
 0x321   : > { %v2099_v50 = vadd.f32 %v2098_v18, %v2097_v33 }
 0x322   : > { %v2409_v4 = vpop.eup %2408  ;;  %v2094_v55 = vadd.f32 %v2093_v11, %v2092_v63 }
 0x323   : > { %v2100_v29 = vrot.slane %v2099_v50, 1  ;;  %v2125_v36 = vmul.f32 %v2409_v4, %v3189_v12 }
 0x324   : > { %v2411_v58 = vpop.eup %2410  ;;  %2416 = vrcp.f32 %v2094_v55 }
 0x325   : > { %v2127_v60 = vmul.f32 %v2411_v58, %v3194_v34  ;;  %v2101_v32 = vadd.f32 %v2100_v29, %v2099_v50 }
 0x327   : > { %v2413_v25 = vpop.eup %2412  ;;  %2418 = vrcp.f32 %v2101_v32  ;;  %v2148_v59 = vcombine.low %v2125_v36, %v2127_v60 }
 0x328   : > { %v2102_v31 = vsel %vm353_vm0, %v2413_v25, 0.0 }
 0x329   : > { %v2415_v38 = vpop.eup %2414  ;;  %v2103_v8 = vrot.slane %v2102_v31, 4  ;;  %2158 = vst [vmem:[%s3186_s16 + $0x10] sm:$0xff] %v2148_v59 }
 0x32a   : > { %v2109_v54 = vsel %vm353_vm0, %v2415_v38, 0.0 }
 0x32b   : > { %v2104_v15 = vadd.f32 %v2103_v8, %v2102_v31  ;;  %v2110_v40 = vrot.slane %v2109_v54, 4 }
 0x32d   : > { %v2105_v46 = vrot.slane %v2104_v15, 2  ;;  %v2111_v37 = vadd.f32 %v2110_v40, %v2109_v54 }
 0x32f   : > { %v2106_v12 = vadd.f32 %v2105_v46, %v2104_v15  ;;  %v2112_v34 = vrot.slane %v2111_v37, 2 }
 0x331   : > { %v2107_v41 = vrot.slane %v2106_v12, 1  ;;  %v2113_v57 = vadd.f32 %v2112_v34, %v2111_v37  ;;  %v2417_v48 = vpop.eup %2416 }
 0x332   : > { %v2129_v21 = vmul.f32 %v2417_v48, %v2405_v19 }
 0x333   : > { %v2108_v45 = vadd.f32 %v2107_v41, %v2106_v12  ;;  %v2114_v27 = vrot.slane %v2113_v57, 1 }
 0x334   : > { %v2419_v39 = vpop.eup %2418 }
 0x335   : > { %v2131_v49 = vmul.f32 %v2419_v39, %v2407_v28  ;;  %2420 = vrcp.f32 %v2108_v45  ;;  %v2115_v6 = vadd.f32 %v2114_v27, %v2113_v57 }
 0x337   : > { %2422 = vrcp.f32 %v2115_v6  ;;  %v2149_v16 = vcombine.low %v2129_v21, %v2131_v49 }
 0x339   : > { %2159 = vst [vmem:[%s3186_s16 + $0x18] sm:$0xff] %v2149_v16 }
 0x342   : > { %v2421_v2 = vpop.eup %2420 }
 0x343   : > { %v2133_v62 = vmul.f32 %v2421_v2, %v2413_v25 }
 0x344   : > { %v2423_v42 = vpop.eup %2422 }
 0x345   : > { %v2135_v0 = vmul.f32 %v2423_v42, %v2415_v38 }
 0x347   : > { %v2150_v53 = vcombine.low %v2133_v62, %v2135_v0 }
 0x349   : > { %2160 = vst [vmem:[%s3186_s16 + $0x20] sm:$0xff] %v2150_v53 }
 0x34a   : > { %2437 = shalt.err (!%p2434_p3)
}
 0x34b   : > { %s2438_s9 = scalar_lea.hbm %s2174_s21, 640  ;;  %s2442_s15 = scalar_lea.hbm %s3256_s7, 1280 }
 0x34c   : > { %p2439_p4 = scmp.ne.s32.totalorder %s2174_s21, %s2438_s9  ;;  %p2443_p9 = scmp.lt.s32.totalorder %s2174_s21, %s3256_s7 }
 0x34d   : > { %p2444_p10 = scmp.lt.s32.totalorder %s2442_s15, %s2438_s9 }
 0x34e   : > { %p2440_p7 = pnand %p2439_p4, %p2567_p5 }
 0x34f   : > { %p2445_p11 = por %p2444_p10, %p2443_p9 }
 0x350   : > { %p2441_p8 = pneg %p2440_p7 }
 0x352   : > { %p2446_p12 = pnand %p2445_p11, %p2441_p8 }
 0x354   : > { %2449 = shalt.err (!%p2446_p12)
}
 0x355   : > { %2323 = dma.vmem_to_hbm [thread:$0]  (%p2567_p5), %s2177_s18, 640, %s2174_s21, %s2162_s22  }
 0x356 PF: > { %p2329_p13 = scmp.ge.s32.totalorder %s2484_s27, 2  ;;  %s2188_s19 = sand.u32 1, %s2472_s24  }
 0x357   : > { %s2189_s20 = scalar_lea.sflag [#allocation3], %s2188_s19 }
 0x358   : > { %p2326_p0 = pnand %p2329_p13, %p2571_p6 }
 0x35a   : > { %p2327_p1 = pneg %p2326_p0 }
 0x35c   : > { %2467 = dma.done.wait (%p2327_p1), %s2189_s20, 640  }
 0x35d   : > { %2469 = vsyncadd (%p2327_p1), %s2189_s20, 4294966656  ;;  %p17_p2 = scmp.ge.s32.totalorder %s2554_s30, 4   ;;  %s3259_s24 = smov %s2476_s25 }
 0x35e   : > { %s3260_s25 = smov %s2480_s26  ;;  %s3261_s26 = smov %s2565_s10 }
 0x35f   : > { %s3262_s27 = smov %s2554_s30  ;;  %19 = sbr.rel (!%p17_p2) target bundleno = 3 (0x3), region = 83 }
 0x364   :  { %2194 = vsyncpa [#allocation3], 1 }
 0x365   :  { %2196 = vsyncpa [#allocation3 + $0x1], 1 }

</bundles_post_ra>
